<compile_context>
chip_gen: v6e
topology: v6e:2x2x1
jax: 0.10.0
libtpu: 0.0.40
codegen_flags: <defaults>
</compile_context>

<pallas_src>
import functools

import jax
import jax.numpy as jnp
from jax import lax
from jax.experimental import pallas as pl
from jax.experimental.pallas import tpu as pltpu


def _conv_bn_kernel(xp_ref, w_ref, scale_ref, shift_ref, o_ref, acc_ref,
                    *, H, W, Cin, Cout, KH, KW, TH):
    """Fused 3x3 conv (stride 1, pad 1) + folded BatchNorm for one row tile.

    xp_ref:    (1, H+2, W+2, Cin)   padded NHWC image of batch element n (native dtype)
    w_ref:     (Cin, KH*KW*Cout)    weights; tap t = kh*KW+kw lives in cols [t*Cout,(t+1)*Cout)
    scale_ref: (1, Cout)            gamma / sqrt(var + eps)                  (f32)
    shift_ref: (1, Cout)            conv_bias*scale + beta - mean*scale      (f32)
    o_ref:     (1, TH, W*Cout)      lane-dense output row tile
    acc_ref:   (TH, W, Cout)        f32 VMEM scratch accumulator
    """
    h = pl.program_id(1)

    # Halo window of this row tile, sliced straight from the input ref in its
    # native dtype (no full-image f32 materialization, no per-tap copies).
    r0 = pl.multiple_of(h * TH, TH)
    xwin = xp_ref[0, pl.ds(r0, TH + KH - 1), :, :]        # (TH+2, W+2, Cin)

    # Single MXU contraction covering all KH*KW taps:
    #   z[a, b, t*Cout + o] = sum_i xwin[a, b, i] * W_oihw[o, i, kh, kw],  t = kh*KW + kw
    z = lax.dot_general(
        xwin, w_ref[...],
        dimension_numbers=(((2,), (0,)), ((), ())),
        preferred_element_type=jnp.float32,
    )                                                     # (TH+2, W+2, KH*KW*Cout) f32

    # Shift-and-add each tap's contribution into the f32 scratch accumulator.
    acc_ref[...] = jnp.zeros_like(acc_ref)
    for kh in range(KH):
        for kw in range(KW):
            t = kh * KW + kw
            acc_ref[...] += lax.slice(
                z, (kh, kw, t * Cout), (kh + TH, kw + W, (t + 1) * Cout))

    # Folded BatchNorm (+ conv bias) epilogue in f32, then one lane-dense store.
    y = acc_ref[...] * scale_ref[...].reshape(1, 1, Cout) \
        + shift_ref[...].reshape(1, 1, Cout)
    o_ref[...] = y.reshape(1, TH, W * Cout).astype(o_ref.dtype)


def conv_bn_relu_forward(x_nchw, w_oihw, conv_bias, gamma, beta,
                         running_mean, running_var, eps=1e-5, padding=1):
    """NCHW in -> NCHW out, matching the PyTorch module's forward (conv + BN, no ReLU)."""
    N, Cin, H, W = x_nchw.shape
    Cout, Cin_w, KH, KW = w_oihw.shape
    assert Cin == Cin_w
    assert padding == (KH - 1) // 2 == (KW - 1) // 2       # "same" conv, stride 1

    # Layout glue (plain JAX): NCHW -> NHWC + spatial pad.
    x_nhwc = jnp.transpose(x_nchw, (0, 2, 3, 1))
    xp = jnp.pad(x_nhwc, ((0, 0), (padding, padding), (padding, padding), (0, 0)))

    # OIHW -> (Cin, KH, KW, Cout) -> (Cin, KH*KW*Cout): one weight matrix whose
    # column block [t*Cout, (t+1)*Cout) holds tap t = kh*KW + kw.  Feeding all
    # taps through a single contraction raises the MXU N-dim from Cout to
    # KH*KW*Cout and cuts 9 matmul pushes to 1.
    w_cat = jnp.transpose(w_oihw, (1, 2, 3, 0)).reshape(Cin, KH * KW * Cout)
    w_cat = w_cat.astype(xp.dtype)

    # Fold BatchNorm (inference mode, running stats) and the conv bias into a
    # per-channel f32 scale/shift.
    inv_std = (gamma / jnp.sqrt(running_var + eps)).astype(jnp.float32)
    scale = inv_std.reshape(1, Cout)
    shift = (conv_bias * inv_std + beta - running_mean * inv_std)
    shift = shift.astype(jnp.float32).reshape(1, Cout)

    # 8 output rows per grid step keeps the output store tile at (8, W*Cout),
    # i.e. sublane-aligned and lane-dense; fall back to full height otherwise.
    TH = 8 if H % 8 == 0 else H
    grid = (N, H // TH)

    kernel = functools.partial(_conv_bn_kernel, H=H, W=W, Cin=Cin, Cout=Cout,
                               KH=KH, KW=KW, TH=TH)

    out_flat = pl.pallas_call(
        kernel,
        out_shape=jax.ShapeDtypeStruct((N, H, W * Cout), x_nchw.dtype),
        grid_spec=pltpu.PrefetchScalarGridSpec(
            num_scalar_prefetch=0,
            grid=grid,
            in_specs=[
                # Padded image of batch n; block index is constant along the
                # row-tile axis, so it is DMA'd once per batch element and the
                # re-fetch is skipped for the remaining row tiles.
                pl.BlockSpec((1, H + 2 * padding, W + 2 * padding, Cin),
                             lambda n, h: (n, 0, 0, 0)),
                pl.BlockSpec((Cin, KH * KW * Cout), lambda n, h: (0, 0)),
                pl.BlockSpec((1, Cout), lambda n, h: (0, 0)),
                pl.BlockSpec((1, Cout), lambda n, h: (0, 0)),
            ],
            out_specs=pl.BlockSpec((1, TH, W * Cout), lambda n, h: (n, h, 0)),
            scratch_shapes=[pltpu.VMEM((TH, W, Cout), jnp.float32)],
        ),
        compiler_params=pltpu.CompilerParams(
            # Row tiles / batch elements are fully independent (no carried
            # state) -> both axes may be sharded across the two v7x
            # TensorCores; harmless on single-TC v5e/v6e.
            dimension_semantics=("parallel", "parallel"),
        ),
    )(xp, w_cat, scale, shift)

    # Lane-dense slab -> (N, H, W, Cout) -> NCHW (single fused reshape+transpose).
    return jnp.transpose(out_flat.reshape(N, H, W, Cout), (0, 3, 1, 2))


def _reference(x_nchw, w_oihw, conv_bias, gamma, beta, mean, var, eps=1e-5):
    """Pure-JAX reference (XLA conv) for correctness checking."""
    z = lax.conv_general_dilated(
        x_nchw.astype(jnp.float32), w_oihw.astype(jnp.float32),
        window_strides=(1, 1), padding=((1, 1), (1, 1)),
        dimension_numbers=("NCHW", "OIHW", "NCHW"))
    z = z + conv_bias.reshape(1, -1, 1, 1)
    inv = gamma / jnp.sqrt(var + eps)
    return (z - mean.reshape(1, -1, 1, 1)) * inv.reshape(1, -1, 1, 1) \
        + beta.reshape(1, -1, 1, 1)


if __name__ == "__main__":
    # Small shapes consistent with the module's forward.
    N, Cin, H, W = 2, 4, 16, 16
    Cout, KS = 8, 3

    key = jax.random.PRNGKey(0)
    k_x, k_w, k_g, k_b, k_m, k_v = jax.random.split(key, 6)

    x = jax.random.normal(k_x, (N, Cin, H, W), dtype=jnp.float32)

    # Conv2d init: kaiming_normal_(a=1) -> gain = 1, std = 1/sqrt(fan_in); bias = 0.
    fan_in = Cin * KS * KS
    w = jax.random.normal(k_w, (Cout, Cin, KS, KS), dtype=jnp.float32) / jnp.sqrt(fan_in)
    conv_bias = jnp.zeros((Cout,), dtype=jnp.float32)

    # BatchNorm2d parameters / running stats (deterministic, nontrivial).
    gamma = 1.0 + 0.1 * jax.random.normal(k_g, (Cout,), dtype=jnp.float32)
    beta = 0.1 * jax.random.normal(k_b, (Cout,), dtype=jnp.float32)
    running_mean = 0.1 * jax.random.normal(k_m, (Cout,), dtype=jnp.float32)
    running_var = 1.0 + 0.1 * jax.random.uniform(k_v, (Cout,), dtype=jnp.float32)

    out = conv_bn_relu_forward(x, w, conv_bias, gamma, beta,
                               running_mean, running_var)
    out = jax.block_until_ready(out)

    ref = _reference(x, w, conv_bias, gamma, beta, running_mean, running_var)
    assert out.shape == (N, Cout, H, W), out.shape
    assert jnp.allclose(out, ref, atol=1e-4, rtol=1e-4), \
        float(jnp.max(jnp.abs(out - ref)))

    print("KERNEL_OK")
</pallas_src>

<mosaic_0001>
module attributes {stable_mosaic.version = 11 : i64} {
  func.func @_conv_bn_kernel(%arg0: i32, %arg1: i32, %arg2: memref<1x18x18x4xf32, #tpu.memory_space<vmem>>, %arg3: memref<4x72xf32, #tpu.memory_space<vmem>>, %arg4: memref<1x8xf32, #tpu.memory_space<vmem>>, %arg5: memref<1x8xf32, #tpu.memory_space<vmem>>, %arg6: memref<1x8x128xf32, #tpu.memory_space<vmem>>, %arg7: memref<8x16x8xf32, #tpu.memory_space<vmem>>) attributes {dimension_semantics = [#tpu.dimension_semantics<parallel>, #tpu.dimension_semantics<parallel>], iteration_bounds = array<i64: 2, 2>, scalar_prefetch = 0 : i64, scratch_operands = 1 : i64, tpu.core_type = #tpu.core_type<tc>, window_params = [{transform_indices = @transform_0, window_bounds = array<i64: 1, 18, 18, 4>}, {pipeline_mode = #tpu.pipeline_mode<synchronous>, transform_indices = @transform_1, window_bounds = array<i64: 4, 72>}, {pipeline_mode = #tpu.pipeline_mode<synchronous>, transform_indices = @transform_2, window_bounds = array<i64: 1, 8>}, {pipeline_mode = #tpu.pipeline_mode<synchronous>, transform_indices = @transform_3, window_bounds = array<i64: 1, 8>}, {transform_indices = @transform_4, window_bounds = array<i64: 1, 8, 128>}]} {
    %c8_i32 = arith.constant 8 : i32
    %0 = arith.muli %arg1, %c8_i32 : i32
    %1 = tpu.assume_multiple %0, 8 : i32
    %c0 = arith.constant 0 : index
    %2 = arith.index_cast %1 : i32 to index
    %c0_0 = arith.constant 0 : index
    %c0_1 = arith.constant 0 : index
    %3 = vector.load %arg2[%c0, %2, %c0_0, %c0_1] : memref<1x18x18x4xf32, #tpu.memory_space<vmem>>, vector<1x10x18x4xf32>
    %4 = vector.shape_cast %3 : vector<1x10x18x4xf32> to vector<10x18x4xf32>
    %c0_2 = arith.constant 0 : index
    %c0_3 = arith.constant 0 : index
    %5 = vector.load %arg3[%c0_2, %c0_3] : memref<4x72xf32, #tpu.memory_space<vmem>>, vector<4x72xf32>
    %cst = arith.constant dense<0.000000e+00> : vector<10x18x72xf32>
    %6 = tpu.matmul %4, %5, %cst {dimension_numbers = #tpu.dot_dimension_numbers<[2], [0], [0, 1], [1], [0, 0, 0, 1, 1, 1], [], []>} : vector<10x18x4xf32>, vector<4x72xf32>, vector<10x18x72xf32> -> vector<10x18x72xf32>
    %cst_4 = arith.constant 0.000000e+00 : f32
    %7 = vector.broadcast %cst_4 : f32 to vector<8x16x8xf32>
    %c0_5 = arith.constant 0 : index
    %c0_6 = arith.constant 0 : index
    %c0_7 = arith.constant 0 : index
    %8 = vector.load %arg7[%c0_5, %c0_6, %c0_7] : memref<8x16x8xf32, #tpu.memory_space<vmem>>, vector<8x16x8xf32>
    tpu.vector_store %arg7[%c0_5, %c0_6, %c0_7], %7 {strides = array<i32>} : memref<8x16x8xf32, #tpu.memory_space<vmem>>, vector<8x16x8xf32>,
    %c0_8 = arith.constant 0 : index
    %c0_9 = arith.constant 0 : index
    %c0_10 = arith.constant 0 : index
    %9 = vector.load %arg7[%c0_8, %c0_9, %c0_10] : memref<8x16x8xf32, #tpu.memory_space<vmem>>, vector<8x16x8xf32>
    %10 = vector.extract_strided_slice %6 {offsets = [0, 0, 0], sizes = [8, 16, 8], strides = [1, 1, 1]} : vector<10x18x72xf32> to vector<8x16x8xf32>
    %11 = arith.addf %9, %10 : vector<8x16x8xf32>
    %c0_11 = arith.constant 0 : index
    %c0_12 = arith.constant 0 : index
    %c0_13 = arith.constant 0 : index
    %12 = vector.load %arg7[%c0_11, %c0_12, %c0_13] : memref<8x16x8xf32, #tpu.memory_space<vmem>>, vector<8x16x8xf32>
    tpu.vector_store %arg7[%c0_11, %c0_12, %c0_13], %11 {strides = array<i32>} : memref<8x16x8xf32, #tpu.memory_space<vmem>>, vector<8x16x8xf32>,
    %c0_14 = arith.constant 0 : index
    %c0_15 = arith.constant 0 : index
    %c0_16 = arith.constant 0 : index
    %13 = vector.load %arg7[%c0_14, %c0_15, %c0_16] : memref<8x16x8xf32, #tpu.memory_space<vmem>>, vector<8x16x8xf32>
    %14 = vector.extract_strided_slice %6 {offsets = [0, 1, 8], sizes = [8, 16, 8], strides = [1, 1, 1]} : vector<10x18x72xf32> to vector<8x16x8xf32>
    %15 = arith.addf %13, %14 : vector<8x16x8xf32>
    %c0_17 = arith.constant 0 : index
    %c0_18 = arith.constant 0 : index
    %c0_19 = arith.constant 0 : index
    %16 = vector.load %arg7[%c0_17, %c0_18, %c0_19] : memref<8x16x8xf32, #tpu.memory_space<vmem>>, vector<8x16x8xf32>
    tpu.vector_store %arg7[%c0_17, %c0_18, %c0_19], %15 {strides = array<i32>} : memref<8x16x8xf32, #tpu.memory_space<vmem>>, vector<8x16x8xf32>,
    %c0_20 = arith.constant 0 : index
    %c0_21 = arith.constant 0 : index
    %c0_22 = arith.constant 0 : index
    %17 = vector.load %arg7[%c0_20, %c0_21, %c0_22] : memref<8x16x8xf32, #tpu.memory_space<vmem>>, vector<8x16x8xf32>
    %18 = vector.extract_strided_slice %6 {offsets = [0, 2, 16], sizes = [8, 16, 8], strides = [1, 1, 1]} : vector<10x18x72xf32> to vector<8x16x8xf32>
    %19 = arith.addf %17, %18 : vector<8x16x8xf32>
    %c0_23 = arith.constant 0 : index
    %c0_24 = arith.constant 0 : index
    %c0_25 = arith.constant 0 : index
    %20 = vector.load %arg7[%c0_23, %c0_24, %c0_25] : memref<8x16x8xf32, #tpu.memory_space<vmem>>, vector<8x16x8xf32>
    tpu.vector_store %arg7[%c0_23, %c0_24, %c0_25], %19 {strides = array<i32>} : memref<8x16x8xf32, #tpu.memory_space<vmem>>, vector<8x16x8xf32>,
    %c0_26 = arith.constant 0 : index
    %c0_27 = arith.constant 0 : index
    %c0_28 = arith.constant 0 : index
    %21 = vector.load %arg7[%c0_26, %c0_27, %c0_28] : memref<8x16x8xf32, #tpu.memory_space<vmem>>, vector<8x16x8xf32>
    %22 = vector.extract_strided_slice %6 {offsets = [1, 0, 24], sizes = [8, 16, 8], strides = [1, 1, 1]} : vector<10x18x72xf32> to vector<8x16x8xf32>
    %23 = arith.addf %21, %22 : vector<8x16x8xf32>
    %c0_29 = arith.constant 0 : index
    %c0_30 = arith.constant 0 : index
    %c0_31 = arith.constant 0 : index
    %24 = vector.load %arg7[%c0_29, %c0_30, %c0_31] : memref<8x16x8xf32, #tpu.memory_space<vmem>>, vector<8x16x8xf32>
    tpu.vector_store %arg7[%c0_29, %c0_30, %c0_31], %23 {strides = array<i32>} : memref<8x16x8xf32, #tpu.memory_space<vmem>>, vector<8x16x8xf32>,
    %c0_32 = arith.constant 0 : index
    %c0_33 = arith.constant 0 : index
    %c0_34 = arith.constant 0 : index
    %25 = vector.load %arg7[%c0_32, %c0_33, %c0_34] : memref<8x16x8xf32, #tpu.memory_space<vmem>>, vector<8x16x8xf32>
    %26 = vector.extract_strided_slice %6 {offsets = [1, 1, 32], sizes = [8, 16, 8], strides = [1, 1, 1]} : vector<10x18x72xf32> to vector<8x16x8xf32>
    %27 = arith.addf %25, %26 : vector<8x16x8xf32>
    %c0_35 = arith.constant 0 : index
    %c0_36 = arith.constant 0 : index
    %c0_37 = arith.constant 0 : index
    %28 = vector.load %arg7[%c0_35, %c0_36, %c0_37] : memref<8x16x8xf32, #tpu.memory_space<vmem>>, vector<8x16x8xf32>
    tpu.vector_store %arg7[%c0_35, %c0_36, %c0_37], %27 {strides = array<i32>} : memref<8x16x8xf32, #tpu.memory_space<vmem>>, vector<8x16x8xf32>,
    %c0_38 = arith.constant 0 : index
    %c0_39 = arith.constant 0 : index
    %c0_40 = arith.constant 0 : index
    %29 = vector.load %arg7[%c0_38, %c0_39, %c0_40] : memref<8x16x8xf32, #tpu.memory_space<vmem>>, vector<8x16x8xf32>
    %30 = vector.extract_strided_slice %6 {offsets = [1, 2, 40], sizes = [8, 16, 8], strides = [1, 1, 1]} : vector<10x18x72xf32> to vector<8x16x8xf32>
    %31 = arith.addf %29, %30 : vector<8x16x8xf32>
    %c0_41 = arith.constant 0 : index
    %c0_42 = arith.constant 0 : index
    %c0_43 = arith.constant 0 : index
    %32 = vector.load %arg7[%c0_41, %c0_42, %c0_43] : memref<8x16x8xf32, #tpu.memory_space<vmem>>, vector<8x16x8xf32>
    tpu.vector_store %arg7[%c0_41, %c0_42, %c0_43], %31 {strides = array<i32>} : memref<8x16x8xf32, #tpu.memory_space<vmem>>, vector<8x16x8xf32>,
    %c0_44 = arith.constant 0 : index
    %c0_45 = arith.constant 0 : index
    %c0_46 = arith.constant 0 : index
    %33 = vector.load %arg7[%c0_44, %c0_45, %c0_46] : memref<8x16x8xf32, #tpu.memory_space<vmem>>, vector<8x16x8xf32>
    %34 = vector.extract_strided_slice %6 {offsets = [2, 0, 48], sizes = [8, 16, 8], strides = [1, 1, 1]} : vector<10x18x72xf32> to vector<8x16x8xf32>
    %35 = arith.addf %33, %34 : vector<8x16x8xf32>
    %c0_47 = arith.constant 0 : index
    %c0_48 = arith.constant 0 : index
    %c0_49 = arith.constant 0 : index
    %36 = vector.load %arg7[%c0_47, %c0_48, %c0_49] : memref<8x16x8xf32, #tpu.memory_space<vmem>>, vector<8x16x8xf32>
    tpu.vector_store %arg7[%c0_47, %c0_48, %c0_49], %35 {strides = array<i32>} : memref<8x16x8xf32, #tpu.memory_space<vmem>>, vector<8x16x8xf32>,
    %c0_50 = arith.constant 0 : index
    %c0_51 = arith.constant 0 : index
    %c0_52 = arith.constant 0 : index
    %37 = vector.load %arg7[%c0_50, %c0_51, %c0_52] : memref<8x16x8xf32, #tpu.memory_space<vmem>>, vector<8x16x8xf32>
    %38 = vector.extract_strided_slice %6 {offsets = [2, 1, 56], sizes = [8, 16, 8], strides = [1, 1, 1]} : vector<10x18x72xf32> to vector<8x16x8xf32>
    %39 = arith.addf %37, %38 : vector<8x16x8xf32>
    %c0_53 = arith.constant 0 : index
    %c0_54 = arith.constant 0 : index
    %c0_55 = arith.constant 0 : index
    %40 = vector.load %arg7[%c0_53, %c0_54, %c0_55] : memref<8x16x8xf32, #tpu.memory_space<vmem>>, vector<8x16x8xf32>
    tpu.vector_store %arg7[%c0_53, %c0_54, %c0_55], %39 {strides = array<i32>} : memref<8x16x8xf32, #tpu.memory_space<vmem>>, vector<8x16x8xf32>,
    %c0_56 = arith.constant 0 : index
    %c0_57 = arith.constant 0 : index
    %c0_58 = arith.constant 0 : index
    %41 = vector.load %arg7[%c0_56, %c0_57, %c0_58] : memref<8x16x8xf32, #tpu.memory_space<vmem>>, vector<8x16x8xf32>
    %42 = vector.extract_strided_slice %6 {offsets = [2, 2, 64], sizes = [8, 16, 8], strides = [1, 1, 1]} : vector<10x18x72xf32> to vector<8x16x8xf32>
    %43 = arith.addf %41, %42 : vector<8x16x8xf32>
    %c0_59 = arith.constant 0 : index
    %c0_60 = arith.constant 0 : index
    %c0_61 = arith.constant 0 : index
    %44 = vector.load %arg7[%c0_59, %c0_60, %c0_61] : memref<8x16x8xf32, #tpu.memory_space<vmem>>, vector<8x16x8xf32>
    tpu.vector_store %arg7[%c0_59, %c0_60, %c0_61], %43 {strides = array<i32>} : memref<8x16x8xf32, #tpu.memory_space<vmem>>, vector<8x16x8xf32>,
    %c0_62 = arith.constant 0 : index
    %c0_63 = arith.constant 0 : index
    %c0_64 = arith.constant 0 : index
    %45 = vector.load %arg7[%c0_62, %c0_63, %c0_64] : memref<8x16x8xf32, #tpu.memory_space<vmem>>, vector<8x16x8xf32>
    %c0_65 = arith.constant 0 : index
    %c0_66 = arith.constant 0 : index
    %46 = vector.load %arg4[%c0_65, %c0_66] : memref<1x8xf32, #tpu.memory_space<vmem>>, vector<1x8xf32>
    %47 = vector.shape_cast %46 : vector<1x8xf32> to vector<1x1x8xf32>
    %48 = vector.broadcast %47 : vector<1x1x8xf32> to vector<8x16x8xf32>
    %49 = arith.mulf %45, %48 : vector<8x16x8xf32>
    %c0_67 = arith.constant 0 : index
    %c0_68 = arith.constant 0 : index
    %50 = vector.load %arg5[%c0_67, %c0_68] : memref<1x8xf32, #tpu.memory_space<vmem>>, vector<1x8xf32>
    %51 = vector.shape_cast %50 : vector<1x8xf32> to vector<1x1x8xf32>
    %52 = vector.broadcast %51 : vector<1x1x8xf32> to vector<8x16x8xf32>
    %53 = arith.addf %49, %52 : vector<8x16x8xf32>
    %54 = vector.shape_cast %53 : vector<8x16x8xf32> to vector<1x8x128xf32>
    %c0_69 = arith.constant 0 : index
    %c0_70 = arith.constant 0 : index
    %c0_71 = arith.constant 0 : index
    %55 = vector.load %arg6[%c0_69, %c0_70, %c0_71] : memref<1x8x128xf32, #tpu.memory_space<vmem>>, vector<1x8x128xf32>
    tpu.vector_store %arg6[%c0_69, %c0_70, %c0_71], %54 {strides = array<i32>} : memref<1x8x128xf32, #tpu.memory_space<vmem>>, vector<1x8x128xf32>,
    return
  }
  func.func @transform_0(%arg0: i32, %arg1: i32) -> (i32, i32, i32, i32) {
    %c0_i32 = arith.constant 0 : i32
    %c0_i32_0 = arith.constant 0 : i32
    %c0_i32_1 = arith.constant 0 : i32
    %c0_i32_2 = arith.constant 0 : i32
    return %arg0, %c0_i32, %c0_i32_0, %c0_i32_1 : i32, i32, i32, i32
  }
  func.func @transform_1(%arg0: i32, %arg1: i32) -> (i32, i32) {
    %c0_i32 = arith.constant 0 : i32
    %c0_i32_0 = arith.constant 0 : i32
    %c0_i32_1 = arith.constant 0 : i32
    return %c0_i32, %c0_i32_0 : i32, i32
  }
  func.func @transform_2(%arg0: i32, %arg1: i32) -> (i32, i32) {
    %c0_i32 = arith.constant 0 : i32
    %c0_i32_0 = arith.constant 0 : i32
    %c0_i32_1 = arith.constant 0 : i32
    return %c0_i32, %c0_i32_0 : i32, i32
  }
  func.func @transform_3(%arg0: i32, %arg1: i32) -> (i32, i32) {
    %c0_i32 = arith.constant 0 : i32
    %c0_i32_0 = arith.constant 0 : i32
    %c0_i32_1 = arith.constant 0 : i32
    return %c0_i32, %c0_i32_0 : i32, i32
  }
  func.func @transform_4(%arg0: i32, %arg1: i32) -> (i32, i32, i32) {
    %c0_i32 = arith.constant 0 : i32
    %c0_i32_0 = arith.constant 0 : i32
    return %arg0, %arg1, %c0_i32 : i32, i32, i32
  }
}

</mosaic_0001>

<bundles_post_ra>
// kernel: tpu_custom_call.1
= control target key start
LH: loop header
LB: loop body
LE: loop exit
PB: predicated region body
PF: predicated region fallthrough
CT: control target
= control target key end

     0   :  { %9 = vsyncpa [#allocation4], 0  ;;  %s6042_s0 = inlined_call_operand.vmem [shape: f32[2,18,18,4], index: 0, kind: input, shape index: {}]   ;;  %s6043_s1 = inlined_call_operand.vmem [shape: f32[4,72], index: 1, kind: input, shape index: {}]   ;;  %s6044_s2 = inlined_call_operand.vmem [shape: f32[1,8], index: 2, kind: input, shape index: {}]   ;;  %s6045_s3 = inlined_call_operand.vmem [shape: f32[1,8], index: 3, kind: input, shape index: {}]   ;;  %s6046_s4 = inlined_call_operand.hbm [shape: f32[2,16,128], index: 4, kind: output, shape index: {}]  }
   0x1   :  { %11 = vsyncpa [#allocation4 + $0x1], 0  ;;  %s4263_s15 = smov 0   ;;  %s4265_s16 = smov 0  }
   0x2   :  { %s4267_s17 = smov 0   ;;  %s4269_s18 = smov 0  }
   0x3   :  { %s4271_s19 = smov 0   ;;  %s4273_s20 = smov 0  }
   0x4   :  { %s4275_s21 = smov 0   ;;  %s4277_s22 = smov 0  }
   0x5 LB: > { %s3866_s23 = sadd.s32 4294967295, %s4216_s22   ;;  %s3867_s24 = sadd.s32 4294967294, %s4216_s22   ;;  %s4216_s22 = sphi %s4277_s22, %s17_s22   ;;  %s4212_s21 = sphi %s4275_s21, %s6130_s21   ;;  %s4208_s20 = sphi %s4273_s20, %s6129_s20   ;;  %s4204_s19 = sphi %s4271_s19, %s6128_s19   ;;  %s4200_s18 = sphi %s4269_s18, %s6127_s18   ;;  %s4196_s17 = sphi %s4267_s17, %s6126_s17   ;;  %s4192_s16 = sphi %s4265_s16, %s6125_s16   ;;  %s4188_s15 = sphi %s4263_s15, %s6124_s15  }
   0x6   : > { %s26_s25 = sadd.s32 1, %s4208_s20  ;;  %s29_s26 = sadd.s32 1, %s4212_s21 }
   0x7   : > { %p27_p0 = scmp.ge.s32.totalorder %s26_s25, 2  ;;  %p137_p1 = scmp.ne.s32.totalorder %s4196_s17, %s4192_s16 }
   0x8   : > { %p138_p2 = scmp.eq.s32.totalorder %s3866_s23, 3  ;;  %p143_p5 = scmp.ne.s32.totalorder %s4192_s16, %s4188_s15 }
   0x9   : > { %s6132_s25 = smov (%p27_p0, %s26_s25), 0  ;;  %s6134_s26 = smov (!%p27_p0, %s29_s26), %s4212_s21 }
   0xa   : > { %s123_s27 = ssub.s32 %s4208_s20, %s6132_s25  ;;  %p4314_p3 = por %p138_p2, %p137_p1 }
   0xb   : > { %p31_p4 = scmp.ge.s32.totalorder %s6134_s26, 2  ;;  %p144_p6 = scmp.eq.s32.totalorder %s3867_s24, 3 }
   0xc   : > { %p3870_p7 = scmp.ge.s32.totalorder %s4216_s22, 1  ;;  %p179_p9 = scmp.lt.s32.totalorder %s4216_s22, 5 }
   0xd   : > { %s6136_s26 = smov (%p31_p4, %s6134_s26), 0  ;;  %p4323_p8 = por %p144_p6, %p143_p5 }
   0xe   : > { %s122_s30 = ssub.s32 %s4212_s21, %s6136_s26  ;;  %s127_s5 = sadd.s32 1, %s4196_s17 }
   0xf   : > { %s124_s6 = sor.u32 %s123_s27, %s122_s30  ;;  %p180_p10 = pnand %p3870_p7, %p179_p9 }
  0x10   : > { %p125_p11 = scmp.eq.s32.totalorder %s124_s6, 0 }
  0x11   : > { %183 = sbr.rel (%p180_p10) target bundleno = 803 (0x323), region = 36 }
  0x12   : > { %s4332_s7 = scalar_select %p125_p11, %s4196_s17, %s127_s5  }
  0x16   : > { %v243_v0 = vld [vmem:[%s6043_s1] sm:$0xf]  ;;  %vm1113_vm0 = vcmask 1043456   ;;  %p205_p12 = scmp.lt.s32.totalorder %s4204_s19, 1  ;;  %v278_v1 = vlaneseq  ;;  %v4218_v2 = vmov 0.0   ;;  %vm4220_vm1 = vmmov 0  }
  0x17   : > { %3940 = vmatprep.subr.mxu0 %v4218_v2  ;;  %4011 = vmatprep.subr.mxu1 %v4218_v2  ;;  %v4219_v3 = vmov 1983009808   ;;  %s3874_s11 = smul.u32 192, %s4200_s18  ;;  %vm1066_vm2 = vcmask 31744   ;;  %vm1702_vm3 = vcmask 64512   ;;  %s4221_s27 = smov 112  }
  0x18   : > { %3941 = vmatpush3.msk.msra.mxu0 %vm1113_vm0, %v243_v0  ;;  %4012 = vmatpush3.msk.msra.mxu1 %vm1113_vm0, %v243_v0  ;;  %s206_s10 = scalar_select %p205_p12, %s4204_s19, 1  ;;  %v276_v4 = vunpack.c.l.s4 %v4219_v3  ;;  %v4341_v5 = vshrl.u32 %v278_v1, 7  ;;  %1703 = vst.msk [vmem:[#allocation2] sm:$0xff] %vm1702_vm3, %v4218_v2  ;;  %1704 = vst.msk [vmem:[#allocation2 + $0x8] sm:$0xff] %vm1702_vm3, %v4218_v2  ;;  %vm2127_vm4 = vcmask 1046528   ;;  %vm3747_vm5 = vcmask 130048  }
  0x19   : > { %3942 = vmatprep.mubr.msk.f32.mxu0 %vm4220_vm1, %v4218_v2  ;;  %3978 = vmatprep.mubr.msk.f32.mxu1 %vm4220_vm1, %v4218_v2  ;;  %1705 = vst.msk [vmem:[#allocation2 + $0x10] sm:$0xff] %vm1702_vm3, %v4218_v2  ;;  %1706 = vst.msk [vmem:[#allocation2 + $0x18] sm:$0xff] %vm1702_vm3, %v4218_v2  ;;  %s4222_s30 = smov 104   ;;  %s4223_s5 = smov 120   ;;  %vm3749_vm6 = vcmask 195584   ;;  %vm3751_vm7 = vcmask 261120  }
  0x1a   : > { %6070 = vst [vmem:[#allocation6_spill] sm:$0xff] %v4341_v5  ;;  %s4013_s12 = smul.u32 432, %s206_s10  ;;  %v277_v6 = vunpack.c.0.s8 %v276_v4  ;;  %1707 = vst.msk [vmem:[#allocation2 + $0x20] sm:$0xff] %vm1702_vm3, %v4218_v2  ;;  %s4224_s6 = smov 88   ;;  %vm3753_vm8 = vcmask 326656   ;;  %vm3755_vm9 = vcmask 392192  }
  0x1b   : > { %1708 = vst.msk [vmem:[#allocation2 + $0x28] sm:$0xff] %vm1702_vm3, %v4218_v2  ;;  %1709 = vst.msk [vmem:[#allocation2 + $0x30] sm:$0xff] %vm1702_vm3, %v4218_v2  ;;  %s4225_s8 = smov 96   ;;  %s4226_s9 = smov 80   ;;  %vm3757_vm10 = vcmask 457728   ;;  %vm3759_vm11 = vcmask 523264  }
  0x1c   : > { %s209_s23 = scalar_lea.vmem %s6042_s0, %s4013_s12  ;;  %v4352_v7 = vsub.s32 %v277_v6, %v4341_v5  ;;  %1710 = vst.msk [vmem:[#allocation2 + $0x38] sm:$0xff] %vm1702_vm3, %v4218_v2  ;;  %1711 = vst.msk [vmem:[#allocation2 + $0x40] sm:$0xff] %vm1702_vm3, %v4218_v2  ;;  %s4227_s10 = smov 72   ;;  %vm3761_vm12 = vcmask 588800   ;;  %vm3763_vm13 = vcmask 654336   ;;  %vm3765_vm14 = vcmask 719872  }
  0x1d   : > { %s4354_s24 = scalar_lea.vmem %s209_s23, %s3874_s11  ;;  %1712 = vst.msk [vmem:[#allocation2 + $0x48] sm:$0xff] %vm1702_vm3, %v4218_v2  ;;  %1713 = vst.msk [vmem:[#allocation2 + $0x50] sm:$0xff] %vm1702_vm3, %v4218_v2  ;;  %s4228_s11 = smov 64   ;;  %vm3767_vm15 = vcmask 785408   ;;  %vm3769_vm0 = vcmask 850944  }
  0x1e   : > { %v213_v8 = vld [vmem:[%s4354_s24] sm:$0xff]  ;;  %v4358_v9 = vld [vmem:[%s4354_s24 + $0x78] sm:$0xff]  ;;  %v214_v15 = vld [vmem:[%s4354_s24 + $0x8] sm:$0xff]  ;;  %1714 = vst.msk [vmem:[#allocation2 + $0x58] sm:$0xff] %vm1702_vm3, %v4218_v2  ;;  %s4235_s12 = smov 40   ;;  %s4236_s13 = smov 56  }
  0x1f   : > { %v229_v10 = vld [vmem:[%s4354_s24 + $0x80] sm:$0xff]  ;;  %v274_v11 = vcombine.high %v213_v8, %v213_v8  ;;  %v281_v12 = vrot.slane %v213_v8, %v4352_v7  ;;  %v479_v13 = vcombine.high %v4358_v9, %v4358_v9  ;;  %v231_v16 = vld [vmem:[%s4354_s24 + $0x90] sm:$0xff]  ;;  %v291_v18 = vcombine.high %v214_v15, %v214_v15  ;;  %v3880_v28 = vld.sshfl [vmem:[%s4354_s24 + $0x88] sm:$0x3 pattern:$0x76325410] }
  0x20   : > { %v496_v14 = vcombine.high %v229_v10, %v229_v10  ;;  %v503_v17 = vrot.slane %v229_v10, %v4352_v7  ;;  %v298_v19 = vrot.slane %v214_v15, %v4352_v7  ;;  %v527_v20 = vrot.slane %v231_v16, %v4352_v7  ;;  %v216_v38 = vld [vmem:[%s4354_s24 + $0x18] sm:$0xff]  ;;  %v3875_v51 = vld.sshfl [vmem:[%s4354_s24 + $0x10] sm:$0x3 pattern:$0x76325410]  ;;  %v217_v57 = vld [vmem:[%s4354_s24 + $0x20] sm:$0xff] }
  0x21   : > { %v288_v21 = vrot.slane %v274_v11, %v4352_v7  ;;  %v289_v22 = vcombine.high %v281_v12, %v281_v12  ;;  %v4371_v23 = vrot.slane %v479_v13, %v4352_v7  ;;  %v305_v26 = vrot.slane %v291_v18, %v4352_v7  ;;  %v232_v43 = vld [vmem:[%s4354_s24 + $0x98] sm:$0xff]  ;;  %v234_v8 = vld [vmem:[%s4354_s24 + $0xa8] sm:$0xff]  ;;  %v219_v10 = vld [vmem:[%s4354_s24 + $0x30] sm:$0xff]  ;;  %1715 = vst.msk [vmem:[#allocation2 + $0x60] sm:$0xff] %vm1702_vm3, %v4218_v2 }
  0x22   : > { %v510_v24 = vrot.slane %v496_v14, %v4352_v7  ;;  %v511_v25 = vcombine.high %v503_v17, %v503_v17  ;;  %v306_v27 = vcombine.high %v298_v19, %v298_v19  ;;  %v535_v29 = vcombine.high %v527_v20, %v527_v20  ;;  %1716 = vst.msk [vmem:[#allocation2 + $0x68] sm:$0xff] %vm1702_vm3, %v4218_v2 }
  0x23   : > { %v290_v30 = vcombine.high %v288_v21, %v288_v21  ;;  %v684_v31 = vcombine.low %v281_v12, %v289_v22  ;;  %v495_v32 = vcombine.high %v4371_v23, %v4371_v23  ;;  %v307_v35 = vcombine.high %v305_v26, %v305_v26  ;;  %1717 = vst.msk [vmem:[#allocation2 + $0x70] sm:$0xff] %vm1702_vm3, %v4218_v2 }
  0x24   : > { %v512_v33 = vcombine.high %v510_v24, %v510_v24  ;;  %v889_v34 = vcombine.low %v511_v25, %v510_v24  ;;  %v701_v36 = vcombine.low %v298_v19, %v306_v27  ;;  %v906_v37 = vcombine.low %v527_v20, %v535_v29  ;;  %v3881_v20 = vld.sshfl [vmem:[%s4354_s24 + $0xa0] sm:$0x3 pattern:$0x76325410]  ;;  %1718 = vst.msk [vmem:[#allocation2 + $0x78] sm:$0xff] %vm1702_vm3, %v4218_v2 }
  0x25   : > { %v685_v39 = vcombine.low %v288_v21, %v290_v30  ;;  %v692_v40 = vrot.slane %v684_v31, %v4352_v7  ;;  %v888_v41 = vcombine.low %v495_v32, %v503_v17  ;;  %v702_v45 = vcombine.low %v305_v26, %v307_v35  ;;  %v3876_v30 = vld.sshfl [vmem:[%s4354_s24 + $0x28] sm:$0x3 pattern:$0x76325410]  ;;  %v220_v31 = vld [vmem:[%s4354_s24 + $0x38] sm:$0xff] }
  0x26   : > { %v905_v42 = vcombine.low %v512_v33, %v3880_v28  ;;  %v903_v44 = vrot.slane %v889_v34, %v4352_v7  ;;  %v709_v46 = vrot.slane %v701_v36, %v4352_v7  ;;  %v920_v47 = vrot.slane %v906_v37, %v4352_v7 }
  0x27   : > { %v699_v48 = vrot.slane %v685_v39, %v4352_v7  ;;  %v896_v49 = vrot.slane %v888_v41, %v4352_v7  ;;  %v315_v52 = vcombine.high %v216_v38, %v216_v38  ;;  %v716_v53 = vrot.slane %v702_v45, %v4352_v7 }
  0x28   : > { %v913_v50 = vrot.slane %v905_v42, %v4352_v7  ;;  %v322_v54 = vrot.slane %v216_v38, %v4352_v7  ;;  %v520_v55 = vcombine.high %v231_v16, %v231_v16  ;;  %v544_v56 = vrot.slane %v232_v43, %v4352_v7 }
  0x29   : > { %v700_v58 = vcombine.low %v692_v40, %v699_v48  ;;  %v904_v59 = vcombine.low %v896_v49, %v903_v44  ;;  %v329_v61 = vrot.slane %v315_v52, %v4352_v7  ;;  %v717_v62 = vcombine.low %v709_v46, %v716_v53  ;;  %v222_v52 = vld [vmem:[%s4354_s24 + $0x48] sm:$0xff] }
  0x2a   : > { %v921_v60 = vcombine.low %v913_v50, %v920_v47  ;;  %v330_v63 = vcombine.high %v322_v54, %v322_v54  ;;  %v718_v0 = vcombine.low %v3875_v51, %v322_v54  ;;  %v534_v1 = vrot.slane %v520_v55, %v4352_v7  ;;  %v235_v47 = vld [vmem:[%s4354_s24 + $0xb0] sm:$0xff] }
  0x2b   : > { %3943 = vmatmul.mubr.msk.f32.vlgmr.msra.gmra.mxu0 %vm1066_vm2, %v700_v58  ;;  %3979 = vmatmul.mubr.msk.f32.vlgmr.msra.gmra.mxu1 %vm1066_vm2, %v904_v59  ;;  %v552_v3 = vcombine.high %v544_v56, %v544_v56  ;;  %v331_v4 = vcombine.high %v329_v61, %v329_v61  ;;  %v332_v6 = vcombine.high %v217_v57, %v217_v57 }
  0x2c   : > { %3945 = vmatprep.mubr.msk.f32.mxu0 %vm4220_vm1, %v4218_v2  ;;  %3981 = vmatprep.mubr.msk.f32.mxu1 %vm4220_vm1, %v4218_v2  ;;  %v719_v11 = vcombine.low %v330_v63, %v329_v61  ;;  %v726_v12 = vrot.slane %v718_v0, %v4352_v7  ;;  %v536_v13 = vcombine.high %v534_v1, %v534_v1 }
  0x2d   : > { %v923_v14 = vcombine.low %v544_v56, %v552_v3  ;;  %v339_v15 = vrot.slane %v217_v57, %v4352_v7  ;;  %v346_v16 = vrot.slane %v332_v6, %v4352_v7  ;;  %v537_v17 = vcombine.high %v232_v43, %v232_v43 }
  0x2e   : > { %v733_v18 = vrot.slane %v719_v11, %v4352_v7  ;;  %v922_v19 = vcombine.low %v534_v1, %v536_v13  ;;  %v568_v21 = vrot.slane %v234_v8, %v4352_v7  ;;  %v363_v22 = vrot.slane %v219_v10, %v4352_v7 }
  0x2f   : > { %3946 = vmatmul.mubr.msk.f32.gmra.mxu0 %vm1066_vm2, %v717_v62  ;;  %3982 = vmatmul.mubr.msk.f32.gmra.mxu1 %vm1066_vm2, %v921_v60  ;;  %v937_v24 = vrot.slane %v923_v14, %v4352_v7  ;;  %v347_v25 = vcombine.high %v339_v15, %v339_v15  ;;  %v735_v26 = vcombine.low %v331_v4, %v339_v15  ;;  %v3877_v60 = vld.sshfl [vmem:[%s4354_s24 + $0x40] sm:$0x3 pattern:$0x76325410]  ;;  %v223_v14 = vld [vmem:[%s4354_s24 + $0x50] sm:$0xff] }
  0x30   : > { %3948 = vmatprep.mubr.msk.f32.mxu0 %vm4220_vm1, %v4218_v2  ;;  %3984 = vmatprep.mubr.msk.f32.mxu1 %vm4220_vm1, %v4218_v2  ;;  %v734_v27 = vcombine.low %v726_v12, %v733_v18  ;;  %v930_v28 = vrot.slane %v922_v19, %v4352_v7  ;;  %v551_v29 = vrot.slane %v537_v17, %v4352_v7 }
  0x31   : > { %v736_v32 = vcombine.low %v347_v25, %v346_v16  ;;  %v743_v33 = vrot.slane %v735_v26, %v4352_v7  ;;  %v940_v34 = vcombine.low %v3881_v20, %v568_v21  ;;  %v348_v35 = vcombine.high %v346_v16, %v346_v16  ;;  %v3882_v26 = vld.sshfl [vmem:[%s4354_s24 + $0xb8] sm:$0x3 pattern:$0x76325410] }
  0x32   : > { %v938_v36 = vcombine.low %v930_v28, %v937_v24  ;;  %v553_v37 = vcombine.high %v551_v29, %v551_v29  ;;  %v371_v38 = vcombine.high %v363_v22, %v363_v22  ;;  %v356_v39 = vcombine.high %v219_v10, %v219_v10 }
  0x33   : > { %3949 = vmatmul.mubr.msk.f32.gmra.mxu0 %vm1066_vm2, %v734_v27  ;;  %v750_v40 = vrot.slane %v736_v32, %v4352_v7  ;;  %v954_v41 = vrot.slane %v940_v34, %v4352_v7  ;;  %v752_v42 = vcombine.low %v348_v35, %v3876_v30  ;;  %v380_v43 = vrot.slane %v220_v31, %v4352_v7 }
  0x34   : > { %3985 = vmatmul.mubr.msk.f32.gmra.mxu1 %vm1066_vm2, %v938_v36  ;;  %3951 = vmatprep.mubr.msk.f32.mxu0 %vm4220_vm1, %v4218_v2  ;;  %v939_v44 = vcombine.low %v551_v29, %v553_v37  ;;  %v753_v45 = vcombine.low %v363_v22, %v371_v38  ;;  %v370_v46 = vrot.slane %v356_v39, %v4352_v7  ;;  %v225_v22 = vld [vmem:[%s4354_s24 + $0x60] sm:$0xff]  ;;  %v226_v37 = vld [vmem:[%s4354_s24 + $0x68] sm:$0xff] }
  0x35   : > { %3987 = vmatprep.mubr.msk.f32.mxu1 %vm4220_vm1, %v4218_v2  ;;  %v751_v48 = vcombine.low %v743_v33, %v750_v40  ;;  %v760_v49 = vrot.slane %v752_v42, %v4352_v7  ;;  %v388_v50 = vcombine.high %v380_v43, %v380_v43  ;;  %v561_v51 = vcombine.high %v234_v8, %v234_v8 }
  0x36   : > { %v947_v53 = vrot.slane %v939_v44, %v4352_v7  ;;  %v767_v54 = vrot.slane %v753_v45, %v4352_v7  ;;  %v372_v55 = vcombine.high %v370_v46, %v370_v46  ;;  %v576_v56 = vcombine.high %v568_v21, %v568_v21 }
  0x37   : > { %3952 = vmatmul.mubr.msk.f32.gmra.mxu0 %vm1066_vm2, %v751_v48  ;;  %v770_v57 = vcombine.low %v380_v43, %v388_v50  ;;  %v575_v58 = vrot.slane %v561_v51, %v4352_v7  ;;  %v585_v59 = vrot.slane %v235_v47, %v4352_v7  ;;  %v373_v61 = vcombine.high %v220_v31, %v220_v31 }
  0x38   : > { %v955_v62 = vcombine.low %v947_v53, %v954_v41  ;;  %3954 = vmatprep.mubr.msk.f32.mxu0 %vm4220_vm1, %v4218_v2  ;;  %v768_v63 = vcombine.low %v760_v49, %v767_v54  ;;  %v769_v0 = vcombine.low %v370_v46, %v372_v55  ;;  %v404_v1 = vrot.slane %v222_v52, %v4352_v7  ;;  %v3878_v49 = vld.sshfl [vmem:[%s4354_s24 + $0x58] sm:$0x3 pattern:$0x76325410] }
  0x39   : > { %v784_v3 = vrot.slane %v770_v57, %v4352_v7  ;;  %v577_v4 = vcombine.high %v575_v58, %v575_v58  ;;  %v956_v6 = vcombine.low %v576_v56, %v575_v58  ;;  %v387_v8 = vrot.slane %v373_v61, %v4352_v7 }
  0x3a   : > { %3988 = vmatmul.mubr.msk.f32.gmra.mxu1 %vm1066_vm2, %v955_v62  ;;  %v777_v10 = vrot.slane %v769_v0, %v4352_v7  ;;  %v787_v11 = vcombine.low %v3877_v60, %v404_v1  ;;  %v578_v12 = vcombine.high %v235_v47, %v235_v47  ;;  %v593_v13 = vcombine.high %v585_v59, %v585_v59  ;;  %v3879_v0 = vld.sshfl [vmem:[%s4354_s24 + $0x70] sm:$0x3 pattern:$0x76325410] }
  0x3b   : > { %3955 = vmatmul.mubr.msk.f32.gmra.mxu0 %vm1066_vm2, %v768_v63  ;;  %3990 = vmatprep.mubr.msk.f32.mxu1 %vm4220_vm1, %v4218_v2  ;;  %v957_v15 = vcombine.low %v577_v4, %v585_v59  ;;  %v964_v16 = vrot.slane %v956_v6, %v4352_v7  ;;  %v389_v17 = vcombine.high %v387_v8, %v387_v8  ;;  %v237_v59 = vld [vmem:[%s4354_s24 + $0xc0] sm:$0xff] }
  0x3c   : > { %3957 = vmatprep.mubr.msk.f32.mxu0 %vm4220_vm1, %v4218_v2  ;;  %v785_v18 = vcombine.low %v777_v10, %v784_v3  ;;  %v801_v19 = vrot.slane %v787_v11, %v4352_v7  ;;  %v592_v20 = vrot.slane %v578_v12, %v4352_v7  ;;  %v397_v21 = vcombine.high %v222_v52, %v222_v52 }
  0x3d   : > { %v971_v24 = vrot.slane %v957_v15, %v4352_v7  ;;  %v786_v25 = vcombine.low %v387_v8, %v389_v17  ;;  %v412_v27 = vcombine.high %v404_v1, %v404_v1  ;;  %v421_v28 = vrot.slane %v223_v14, %v4352_v7  ;;  %v238_v17 = vld [vmem:[%s4354_s24 + $0xc8] sm:$0xff] }
  0x3e   : > { %v594_v29 = vcombine.high %v592_v20, %v592_v20  ;;  %v973_v30 = vcombine.low %v593_v13, %v592_v20  ;;  %v411_v31 = vrot.slane %v397_v21, %v4352_v7  ;;  %v414_v32 = vcombine.high %v223_v14, %v223_v14  ;;  %v240_v20 = vld [vmem:[%s4354_s24 + $0xd8] sm:$0xff] }
  0x3f   : > { %3958 = vmatmul.mubr.msk.f32.gmra.mxu0 %vm1066_vm2, %v785_v18  ;;  %v972_v33 = vcombine.low %v964_v16, %v971_v24  ;;  %v794_v34 = vrot.slane %v786_v25, %v4352_v7  ;;  %v429_v35 = vcombine.high %v421_v28, %v421_v28  ;;  %v438_v36 = vcombine.high %v225_v22, %v225_v22 }
  0x40   : > { %3960 = vmatprep.mubr.msk.f32.mxu0 %vm4220_vm1, %v4218_v2  ;;  %v974_v38 = vcombine.low %v594_v29, %v3882_v26  ;;  %v981_v39 = vrot.slane %v973_v30, %v4352_v7  ;;  %v413_v40 = vcombine.high %v411_v31, %v411_v31  ;;  %v803_v41 = vcombine.low %v412_v27, %v411_v31  ;;  %v3883_v29 = vld.sshfl [vmem:[%s4354_s24 + $0xd0] sm:$0x3 pattern:$0x76325410] }
  0x41   : > { %3991 = vmatmul.mubr.msk.f32.gmra.mxu1 %vm1066_vm2, %v972_v33  ;;  %v802_v42 = vcombine.low %v794_v34, %v801_v19  ;;  %v428_v43 = vrot.slane %v414_v32, %v4352_v7  ;;  %v445_v44 = vrot.slane %v225_v22, %v4352_v7  ;;  %v452_v45 = vrot.slane %v438_v36, %v4352_v7 }
  0x42   : > { %3993 = vmatprep.mubr.msk.f32.mxu1 %vm4220_vm1, %v4218_v2  ;;  %v988_v46 = vrot.slane %v974_v38, %v4352_v7  ;;  %v804_v47 = vcombine.low %v413_v40, %v421_v28  ;;  %v811_v48 = vrot.slane %v803_v41, %v4352_v7  ;;  %v455_v50 = vcombine.high %v226_v37, %v226_v37  ;;  %v241_v38 = vld [vmem:[%s4354_s24 + $0xe0] sm:$0xff] }
  0x43   : > { %3961 = vmatmul.mubr.msk.f32.gmra.mxu0 %vm1066_vm2, %v802_v42  ;;  %v430_v51 = vcombine.high %v428_v43, %v428_v43  ;;  %v820_v52 = vcombine.low %v429_v35, %v428_v43  ;;  %v453_v53 = vcombine.high %v445_v44, %v445_v44  ;;  %v454_v54 = vcombine.high %v452_v45, %v452_v45 }
  0x44   : > { %v989_v55 = vcombine.low %v981_v39, %v988_v46  ;;  %3963 = vmatprep.mubr.msk.f32.mxu0 %vm4220_vm1, %v4218_v2  ;;  %v818_v56 = vrot.slane %v804_v47, %v4352_v7  ;;  %v462_v57 = vrot.slane %v226_v37, %v4352_v7  ;;  %v469_v58 = vrot.slane %v455_v50, %v4352_v7 }
  0x45   : > { %v821_v60 = vcombine.low %v430_v51, %v3878_v49  ;;  %v828_v61 = vrot.slane %v820_v52, %v4352_v7  ;;  %v837_v62 = vcombine.low %v445_v44, %v453_v53  ;;  %v838_v63 = vcombine.low %v452_v45, %v454_v54 }
  0x46   : > { %3994 = vmatmul.mubr.msk.f32.gmra.mxu1 %vm1066_vm2, %v989_v55  ;;  %v819_v1 = vcombine.low %v811_v48, %v818_v56  ;;  %v470_v3 = vcombine.high %v462_v57, %v462_v57  ;;  %v471_v4 = vcombine.high %v469_v58, %v469_v58  ;;  %v486_v6 = vrot.slane %v4358_v9, %v4352_v7 }
  0x47   : > { %v835_v8 = vrot.slane %v821_v60, %v4352_v7  ;;  %v845_v10 = vrot.slane %v837_v62, %v4352_v7  ;;  %v852_v11 = vrot.slane %v838_v63, %v4352_v7  ;;  %3996 = vmatprep.mubr.msk.f32.mxu1 %vm4220_vm1, %v4218_v2  ;;  %v602_v12 = vcombine.high %v237_v59, %v237_v59 }
  0x48   : > { %3964 = vmatmul.mubr.msk.f32.gmra.mxu0 %vm1066_vm2, %v819_v1  ;;  %v854_v13 = vcombine.low %v462_v57, %v470_v3  ;;  %v855_v14 = vcombine.low %v469_v58, %v471_v4  ;;  %v494_v15 = vcombine.high %v486_v6, %v486_v6  ;;  %v871_v16 = vcombine.low %v3879_v0, %v486_v6  ;;  %v3884_v4 = vld.sshfl [vmem:[%s4354_s24 + $0xe8] sm:$0x3 pattern:$0x76325410]  ;;  %s4230_s24 = smov 16  }
  0x49   : > { %3966 = vmatprep.mubr.msk.f32.mxu0 %vm4220_vm1, %v4218_v2  ;;  %v836_v9 = vcombine.low %v828_v61, %v835_v8  ;;  %v609_v18 = vrot.slane %v237_v59, %v4352_v7  ;;  %v616_v19 = vrot.slane %v602_v12, %v4352_v7  ;;  %v853_v21 = vcombine.low %v845_v10, %v852_v11 }
  0x4a   : > { %v862_v22 = vrot.slane %v854_v13, %v4352_v7  ;;  %v869_v24 = vrot.slane %v855_v14, %v4352_v7  ;;  %v619_v27 = vcombine.high %v238_v17, %v238_v17  ;;  %v626_v28 = vrot.slane %v238_v17, %v4352_v7 }
  0x4b   : > { %v617_v25 = vcombine.high %v609_v18, %v609_v18  ;;  %v618_v26 = vcombine.high %v616_v19, %v616_v19  ;;  %v872_v30 = vcombine.low %v494_v15, %v4371_v23  ;;  %v879_v31 = vrot.slane %v871_v16, %v4352_v7 }
  0x4c   : > { %3967 = vmatmul.mubr.msk.f32.gmra.mxu0 %vm1066_vm2, %v836_v9  ;;  %v643_v32 = vcombine.high %v240_v20, %v240_v20  ;;  %v650_v33 = vrot.slane %v240_v20, %v4352_v7  ;;  %v633_v36 = vrot.slane %v619_v27, %v4352_v7  ;;  %v634_v37 = vcombine.high %v626_v28, %v626_v28 }
  0x4d   : > { %3969 = vmatprep.mubr.msk.f32.mxu0 %vm4220_vm1, %v4218_v2  ;;  %v990_v34 = vcombine.low %v609_v18, %v617_v25  ;;  %v991_v35 = vcombine.low %v616_v19, %v618_v26  ;;  %v870_v39 = vcombine.low %v862_v22, %v869_v24  ;;  %v886_v46 = vrot.slane %v872_v30, %v4352_v7 }
  0x4e   : > { %v657_v40 = vrot.slane %v643_v32, %v4352_v7  ;;  %v658_v41 = vcombine.high %v650_v33, %v650_v33  ;;  %v1024_v42 = vcombine.low %v3883_v29, %v650_v33  ;;  %v635_v44 = vcombine.high %v633_v36, %v633_v36 }
  0x4f   : > { %v998_v23 = vrot.slane %v990_v34, %v4352_v7  ;;  %v1005_v43 = vrot.slane %v991_v35, %v4352_v7  ;;  %v1007_v45 = vcombine.low %v626_v28, %v634_v37  ;;  %v660_v49 = vcombine.high %v241_v38, %v241_v38 }
  0x50   : > { %3970 = vmatmul.mubr.msk.f32.gmra.mxu0 %vm1066_vm2, %v853_v21  ;;  %v1025_v47 = vcombine.low %v658_v41, %v657_v40  ;;  %v659_v48 = vcombine.high %v657_v40, %v657_v40  ;;  %v1008_v51 = vcombine.low %v633_v36, %v635_v44  ;;  %v667_v53 = vrot.slane %v241_v38, %v4352_v7 }
  0x51   : > { %3972 = vmatprep.mubr.msk.f32.mxu0 %vm4220_vm1, %v4218_v2  ;;  %v1006_v50 = vcombine.low %v998_v23, %v1005_v43  ;;  %v1015_v52 = vrot.slane %v1007_v45, %v4352_v7  ;;  %v1032_v54 = vrot.slane %v1024_v42, %v4352_v7  ;;  %v674_v55 = vrot.slane %v660_v49, %v4352_v7 }
  0x52   : > { %v1022_v56 = vrot.slane %v1008_v51, %v4352_v7  ;;  %v1039_v57 = vrot.slane %v1025_v47, %v4352_v7  ;;  %v675_v58 = vcombine.high %v667_v53, %v667_v53  ;;  %v1041_v59 = vcombine.low %v659_v48, %v667_v53 }
  0x53   : > { %3997 = vmatmul.mubr.msk.f32.gmra.mxu1 %vm1066_vm2, %v1006_v50  ;;  %v887_v60 = vcombine.low %v879_v31, %v886_v46  ;;  %v676_v3 = vcombine.high %v674_v55, %v674_v55 }
  0x54   : > { %3973 = vmatmul.mubr.msk.f32.gmra.mxu0 %vm1066_vm2, %v870_v39  ;;  %3999 = vmatprep.mubr.msk.f32.mxu1 %vm4220_vm1, %v4218_v2  ;;  %v1023_v61 = vcombine.low %v1015_v52, %v1022_v56  ;;  %v1042_v62 = vcombine.low %v675_v58, %v674_v55  ;;  %v1040_v63 = vcombine.low %v1032_v54, %v1039_v57 }
  0x55   : > { %3975 = vmatprep.mubr.msk.f32.mxu0 %vm4220_vm1, %v4218_v2  ;;  %v1049_v0 = vrot.slane %v1041_v59, %v4352_v7  ;;  %v1058_v8 = vcombine.low %v676_v3, %v3884_v4 }
  0x56   : > { %v1056_v1 = vrot.slane %v1042_v62, %v4352_v7 }
  0x57   : > { %4000 = vmatmul.mubr.msk.f32.gmra.mxu1 %vm1066_vm2, %v1023_v61  ;;  %v1065_v10 = vrot.slane %v1058_v8, %v4352_v7 }
  0x58   : > { %3976 = vmatmul.mubr.msk.f32.gmra.mxu0 %vm1066_vm2, %v887_v60  ;;  %4002 = vmatprep.mubr.msk.f32.mxu1 %vm4220_vm1, %v4218_v2  ;;  %v1057_v6 = vcombine.low %v1049_v0, %v1056_v1 }
  0x5b   : > { %4003 = vmatmul.mubr.msk.f32.gmra.mxu1 %vm1066_vm2, %v1040_v63 }
  0x5c   : > { %4005 = vmatprep.mubr.msk.f32.mxu1 %vm4220_vm1, %v4218_v2 }
  0x5f   : > { %4006 = vmatmul.mubr.msk.f32.gmra.mxu1 %vm1066_vm2, %v1057_v6 }
  0x60   : > { %4008 = vmatprep.mubr.msk.f32.mxu1 %vm4220_vm1, %v4218_v2  ;;  %vm3771_vm1 = vcmask 916480  }
  0x63   : > { %4009 = vmatmul.mubr.msk.f32.gmra.mxu1 %vm1066_vm2, %v1065_v10  ;;  %vm3773_vm2 = vcmask 982016  }
  0xeb   : > { %v1183_v11 = vpop.f32.mrf.mxu0  ;;  %v1243_v12 = vpop.f32.mrf.mxu1 }
  0xec   : > { %v4579_v13 = vrot.slane %v1243_v12, %v4352_v7  ;;  %v1320_v14 = vcombine.high %v1183_v11, %v1183_v11  ;;  %v1524_v17 = vcombine.high %v1243_v12, %v1243_v12  ;;  %v4586_v20 = vrot.slane %v1183_v11, %v4352_v7 }
  0xed   : > { %v3944_v15 = vpop.f32.mrf.mxu0  ;;  %v3980_v16 = vpop.f32.mrf.mxu1 }
  0xee   : > { %v4583_v9 = vcombine.high %v4579_v13, %v4579_v13  ;;  %v4591_v21 = vrot.slane %v1320_v14, %v4352_v7  ;;  %v1538_v25 = vrot.slane %v1524_v17, %v4352_v7  ;;  %v4599_v28 = vcombine.high %v4586_v20, %v4586_v20 }
  0xef   : > { %v1188_v18 = vpop.f32.mrf.mxu0  ;;  %v1248_v19 = vpop.f32.mrf.mxu1 }
  0xf0   : > { %v1548_v26 = vrot.slane %v1248_v19, %v4352_v7  ;;  %v4604_v30 = vrot.slane %v1188_v18, %v4352_v7  ;;  %v4608_v32 = vcombine.high %v4591_v21, %v4591_v21  ;;  %v1540_v33 = vcombine.high %v1538_v25, %v1538_v25 }
  0xf1   : > { %v3947_v22 = vpop.f32.mrf.mxu0  ;;  %v3983_v24 = vpop.f32.mrf.mxu1  ;;  %v2264_v36 = vcombine.low %v4599_v28, %v4591_v21  ;;  %v1337_v37 = vcombine.high %v1188_v18, %v1188_v18  ;;  %v1541_v45 = vcombine.high %v1248_v19, %v1248_v19  ;;  %v1922_v47 = vcombine.low %v4583_v9, %v1538_v25 }
  0xf2   : > { %v1556_v34 = vcombine.high %v1548_v26, %v1548_v26  ;;  %v2265_v39 = vcombine.low %v4608_v32, %v4604_v30  ;;  %v1923_v41 = vcombine.low %v1540_v33, %v1548_v26  ;;  %v2451_v49 = vcombine.low %v1538_v25, %v1540_v33 }
  0xf3   : > { %v4595_v27 = vpop.f32.mrf.mxu0  ;;  %v2272_v43 = vrot.slane %v2264_v36, %v4352_v7  ;;  %v4620_v44 = vrot.slane %v1337_v37, %v4352_v7  ;;  %v1555_v58 = vrot.slane %v1541_v45, %v4352_v7  ;;  %v1930_v62 = vrot.slane %v1922_v47, %v4352_v7 }
  0xf4   : > { %v4601_v29 = vpop.f32.mrf.mxu1  ;;  %v2452_v42 = vcombine.low %v1548_v26, %v1556_v34  ;;  %v2279_v48 = vrot.slane %v2265_v39, %v4352_v7  ;;  %v1937_v53 = vrot.slane %v1923_v41, %v4352_v7  ;;  %v2459_v55 = vrot.slane %v2451_v49, %v4352_v7 }
  0xf5   : > { %v3950_v31 = vpop.f32.mrf.mxu0  ;;  %v4628_v51 = vrot.slane %v4601_v29, %v4352_v7  ;;  %v4635_v57 = vcombine.high %v4620_v44, %v4620_v44  ;;  %v4640_v59 = vrot.slane %v4595_v27, %v4352_v7  ;;  %v2112_v63 = vrot.slane %v1556_v34, %v4352_v7 }
  0xf6   : > { %v3986_v35 = vpop.f32.mrf.mxu1  ;;  %v2280_v54 = vcombine.low %v2272_v43, %v2279_v48  ;;  %v2466_v56 = vrot.slane %v2452_v42, %v4352_v7  ;;  %v4655_v4 = vcombine.low %v1930_v62, %v1937_v53  ;;  %v4659_v6 = vcombine.high %v4604_v30, %v4604_v30 }
  0xf7   : > { %v4612_v38 = vpop.f32.mrf.mxu0  ;;  %v1573_v0 = vcombine.high %v4628_v51, %v4628_v51  ;;  %v1557_v8 = vcombine.high %v1555_v58, %v1555_v58  ;;  %v2282_v10 = vcombine.low %v4635_v57, %v4640_v59  ;;  %v2156_v15 = vrot.slane %v2112_v63, 1 }
  0xf8   : > { %2536 = vrot.lane.b32.xlu0 %v2280_v54, %s4221_s27  ;;  %v4645_v61 = vcombine.low %v2459_v55, %v2466_v56  ;;  %6072 = vst [vmem:[#allocation8_spill] sm:$0xff] %v4655_v4  ;;  %v6047_v14 = vrot.slane %v4655_v4, 1  ;;  %v1558_v16 = vcombine.high %v4601_v29, %v4601_v29  ;;  %v2281_v18 = vcombine.low %v4659_v6, %v4620_v44 }
  0xf9   : > { %v3953_v40 = vpop.f32.mrf.mxu0  ;;  %v1940_v17 = vcombine.low %v4628_v51, %v1573_v0  ;;  %v1939_v25 = vcombine.low %v1555_v58, %v1557_v8  ;;  %v2296_v29 = vrot.slane %v2282_v10, %v4352_v7  ;;  %v1354_v42 = vcombine.high %v4595_v27, %v4595_v27 }
  0xfa   : > { %v4616_v23 = vpop.f32.mrf.mxu1  ;;  %6071 = vst [vmem:[#allocation7_spill] sm:$0xff] %v4645_v61  ;;  %2558 = vrot.lane.b32.xlu1 %v4645_v61, %s4221_s27  ;;  %v4676_v22 = vsel %vm2127_vm4, %v6047_v14, %v2156_v15  ;;  %v2289_v26 = vrot.slane %v2281_v18, %v4352_v7  ;;  %v1572_v34 = vrot.slane %v1558_v16, %v4352_v7 }
  0xfb   : > { %v4622_v46 = vpop.f32.mrf.mxu0  ;;  %6073 = vst [vmem:[#allocation9_spill] sm:$0xff] %v4676_v22  ;;  %v1954_v35 = vrot.slane %v1940_v17, %v4352_v7  ;;  %v1575_v36 = vcombine.high %v4616_v23, %v4616_v23  ;;  %v1582_v39 = vrot.slane %v4616_v23, %v4352_v7  ;;  %v1947_v41 = vrot.slane %v1939_v25, %v4352_v7 }
  0xfc   : > { %v3989_v50 = vpop.f32.mrf.mxu1  ;;  %2684 = vrot.lane.b32.xlu0 %v4655_v4, %s4222_s30  ;;  %v2297_v37 = vcombine.low %v2289_v26, %v2296_v29  ;;  %v1574_v43 = vcombine.high %v1572_v34, %v1572_v34  ;;  %v2468_v45 = vcombine.low %v1557_v8, %v4628_v51  ;;  %v1371_v23 = vcombine.high %v4612_v38, %v4612_v38 }
  0xfd   : > { %v3956_v52 = vpop.f32.mrf.mxu0  ;;  %v4706_v48 = vrot.slane %v1575_v36, %v4352_v7  ;;  %v4708_v49 = vcombine.low %v1947_v41, %v1954_v35  ;;  %v2469_v50 = vcombine.low %v1573_v0, %v1572_v34  ;;  %v1735_v27 = vcombine.low %v4586_v20, %v4599_v28 }
  0xfe   : > { %2190 = vrot.lane.b32.xlu1 %v4676_v22, %s4223_s5  ;;  %v1590_v52 = vcombine.high %v1582_v39, %v1582_v39  ;;  %v2485_v51 = vcombine.low %v1574_v43, %v1582_v39  ;;  %v4715_v54 = vrot.slane %v1354_v42, %v4352_v7  ;;  %v1736_v55 = vcombine.low %v4591_v21, %v4608_v32 }
  0xff   : > { %v4642_v60 = vpop.f32.mrf.mxu0  ;;  %v2476_v56 = vrot.slane %v2468_v45, %v4352_v7  ;;  %v2483_v58 = vrot.slane %v2469_v50, %v4352_v7  ;;  %v4724_v20 = vrot.slane %v1371_v23, %v4352_v7  ;;  %v1743_v63 = vrot.slane %v1735_v27, %v4352_v7  ;;  %v1720_v45 = vld [vmem:[#allocation2 + $0x8] sm:$0xff] }
 0x100   : > { %2922 = vrot.lane.b32.xlu0 %v4645_v61, %s4224_s6  ;;  %v2486_v28 = vcombine.low %v1590_v52, %v4706_v48  ;;  %v1957_v0 = vcombine.low %v1582_v39, %v1590_v52  ;;  %v2493_v8 = vrot.slane %v2485_v51, %v4352_v7  ;;  %v1752_v21 = vcombine.low %v4604_v30, %v4659_v6 }
 0x101   : > { %v3959_v1 = vpop.f32.mrf.mxu0  ;;  %v4651_v3 = vpop.f32.mrf.mxu1  ;;  %v1753_v32 = vcombine.low %v4620_v44, %v4635_v57  ;;  %v4740_v17 = vcombine.high %v4715_v54, %v4715_v54  ;;  %v4744_v18 = vrot.slane %v4612_v38, %v4352_v7  ;;  %v1750_v30 = vrot.slane %v1736_v55, %v4352_v7 }
 0x102   : > { %2538 = vrot.lane.b32.xlu1 %v2297_v37, %s4221_s27  ;;  %v4728_v1 = vcombine.low %v2476_v56, %v2483_v58  ;;  %v2500_v15 = vrot.slane %v2486_v28, %v4352_v7  ;;  %v1369_v57 = vcombine.high %v4640_v59, %v4640_v59  ;;  %v4757_v6 = vcombine.high %v4724_v20, %v4724_v20 }
 0x103   : > { %v4663_v11 = vpop.f32.mrf.mxu0  ;;  %v3992_v12 = vpop.f32.mrf.mxu1  ;;  %v1388_v38 = vcombine.high %v4622_v46, %v4622_v46  ;;  %v1971_v25 = vrot.slane %v1957_v0, %v4352_v7  ;;  %v4764_v26 = vrot.slane %v4622_v46, %v4352_v7  ;;  %v1760_v36 = vrot.slane %v1752_v21, %v4352_v7 }
 0x104   : > { %2792 = vrot.lane.b32.xlu0 %v4676_v22, %s4225_s8  ;;  %6074 = vst [vmem:[#allocation10_spill] sm:$0xff] %v4728_v1  ;;  %v1956_v12 = vcombine.low %v1572_v34, %v1574_v43  ;;  %v4766_v29 = vcombine.low %v2493_v8, %v2500_v15  ;;  %v1751_v34 = vcombine.low %v1743_v63, %v1750_v30 }
 0x105   : > { %v3962_v19 = vpop.f32.mrf.mxu0  ;;  %v1767_v37 = vrot.slane %v1753_v32, %v4352_v7  ;;  %v2077_v46 = vrot.slane %v4640_v59, %v4352_v7  ;;  %v4779_v42 = vcombine.high %v4744_v18, %v4744_v18  ;;  %v1770_v43 = vcombine.low %v4740_v17, %v4744_v18 }
 0x106   : > { %v4678_v24 = vpop.f32.mrf.mxu1  ;;  %2686 = vrot.lane.b32.xlu1 %v4708_v49, %s4222_s30  ;;  %6075 = vst [vmem:[#allocation11_spill] sm:$0xff] %v4766_v29  ;;  %v1964_v39 = vrot.slane %v1956_v12, %v4352_v7  ;;  %v1405_v59 = vcombine.high %v4642_v60, %v4642_v60  ;;  %v4799_v55 = vcombine.high %v4764_v26, %v4764_v26  ;;  %v2128_v0 = vrot.slane %v1751_v34, 1 }
 0x107   : > { %v1768_v50 = vcombine.low %v1760_v36, %v1767_v37  ;;  %v1787_v56 = vcombine.low %v4757_v6, %v4764_v26  ;;  %v4807_v63 = vrot.slane %v4642_v60, %v4352_v7  ;;  %v1592_v32 = vcombine.high %v4651_v3, %v4651_v3 }
 0x108   : > { %v4686_v31 = vpop.f32.mrf.mxu0  ;;  %v3995_v33 = vpop.f32.mrf.mxu1  ;;  %2560 = vrot.lane.b32.xlu0 %v4728_v1, %s4221_s27  ;;  %v4803_v58 = vcombine.low %v1964_v39, %v1971_v25  ;;  %v1769_v15 = vcombine.low %v1369_v57, %v4715_v54  ;;  %v2299_v30 = vcombine.low %v4744_v18, %v4779_v42  ;;  %v1784_v25 = vrot.slane %v1770_v43, %v4352_v7 }
 0x109   : > { %v1719_v33 = vld [vmem:[#allocation2] sm:$0xff]  ;;  %v2129_v8 = vrot.slane %v1768_v50, 1  ;;  %v4837_v57 = vrot.slane %v1405_v59, %v4352_v7  ;;  %v4844_v36 = vcombine.high %v4807_v63, %v4807_v63  ;;  %v1591_v37 = vcombine.high %v4706_v48, %v4706_v48  ;;  %v1721_v59 = vld [vmem:[#allocation2 + $0x10] sm:$0xff] }
 0x10a   : > { %v3965_v40 = vpop.f32.mrf.mxu0  ;;  %2924 = vrot.lane.b32.xlu1 %v4728_v1, %s4224_s6  ;;  %v2023_v27 = vadd.f32 %v1751_v34, %v1719_v33  ;;  %v1777_v39 = vrot.slane %v1769_v15, %v4352_v7  ;;  %v4855_v43 = vrot.slane %v4651_v3, %v4352_v7  ;;  %v2119_v3 = vrot.slane %v4706_v48, %v4352_v7 }
 0x10b   : > { %v1804_v48 = vcombine.low %v4807_v63, %v4844_v36 }
 0x10c   : > { %v4701_v47 = vpop.f32.mrf.mxu0  ;;  %3050 = vrot.lane.b32.xlu0 %v4708_v49, %s4226_s9  ;;  %2039 = vst.msk [vmem:[#allocation2] sm:$0xff] %vm1702_vm3, %v2023_v27  ;;  %v2298_v27 = vcombine.low %v4715_v54, %v4740_v17  ;;  %v1609_v54 = vcombine.high %v4678_v24, %v4678_v24  ;;  %v4881_v17 = vrot.slane %v4678_v24, %v4352_v7 }
 0x10d   : > { %v1456_v18 = vcombine.high %v4701_v47, %v4701_v47  ;;  %v4979_v5 = vrot.slane %v4701_v47, %v4352_v7 }
 0x10e   : > { %v3968_v53 = vpop.f32.mrf.mxu0  ;;  %2562 = vrot.lane.b32.xlu1 %v4766_v29, %s4221_s27  ;;  %v2306_v24 = vrot.slane %v2298_v27, %v4352_v7  ;;  %v4916_v27 = vrot.slane %v1609_v54, %v4352_v7  ;;  %v1973_v54 = vcombine.low %v1591_v37, %v4855_v43  ;;  %v4951_v37 = vrot.slane %v4686_v31, %v4352_v7 }
 0x10f   : > { %v4795_v53 = vrot.slane %v1388_v38, %v4352_v7  ;;  %v2130_v38 = vsel %vm2127_vm4, %v2128_v0, %v2129_v8  ;;  %6078 = vst [vmem:[#allocation14_spill] sm:$0xff] %v4979_v5  ;;  %v5010_v61 = vrot.slane %v1456_v18, %v4352_v7 }
 0x110   : > { %v4721_v62 = vpop.f32.mrf.mxu0  ;;  %2168 = vrot.lane.b32.xlu0 %v2130_v38, %s4223_s5  ;;  %6077 = vst [vmem:[#allocation13_spill] sm:$0xff] %v4951_v37 }
 0x111   : > { %v4832_v34 = vcombine.high %v4795_v53, %v4795_v53  ;;  %v1473_v1 = vcombine.high %v4721_v62, %v4721_v62 }
 0x112   : > { %v3971_v10 = vpop.f32.mrf.mxu0  ;;  %2688 = vrot.lane.b32.xlu1 %v4803_v58, %s4222_s30 }
 0x113   : > { %v4736_v16 = vpop.f32.mrf.mxu1  ;;  %v2024_v10 = vadd.f32 %v1768_v50, %v1720_v45  ;;  %v4858_v45 = vrot.slane %v1592_v32, %v4352_v7  ;;  %v1801_v50 = vrot.slane %v1787_v56, %v4352_v7  ;;  %v4875_v32 = vcombine.high %v4837_v57, %v4837_v57  ;;  %v1722_v56 = vld [vmem:[#allocation2 + $0x18] sm:$0xff] }
 0x114   : > { %v4751_v44 = vpop.f32.mrf.mxu0 }
 0x115   : > { %v3998_v19 = vpop.f32.mrf.mxu1  ;;  %v1490_v40 = vcombine.high %v4751_v44, %v4751_v44  ;;  %2040 = vst.msk [vmem:[#allocation2 + $0x8] sm:$0xff] %vm1702_vm3, %v2024_v10  ;;  %v1803_v10 = vcombine.low %v4795_v53, %v4832_v34  ;;  %v1422_v53 = vcombine.high %v4663_v11, %v4663_v11 }
 0x116   : > { %v3974_v35 = vpop.f32.mrf.mxu0  ;;  %v2131_v19 = vrot.slane %v2077_v46, 1  ;;  %2926 = vrot.lane.b32.xlu1 %v4766_v29, %s4224_s6 }
 0x117   : > { %v4773_v41 = vpop.f32.mrf.mxu1  ;;  %v4792_v52 = vrot.slane %v1490_v40, %v4352_v7  ;;  %v1786_v40 = vcombine.low %v4779_v42, %v4724_v20  ;;  %v5021_v35 = vcombine.high %v4979_v5, %v4979_v5 }
 0x118   : > { %v4787_v23 = vpop.f32.mrf.mxu0  ;;  %v2132_v42 = vsel %vm2127_vm4, %v2129_v8, %v2131_v19  ;;  %v4895_v19 = vrot.slane %v4663_v11, %v4352_v7  ;;  %v5051_v22 = vrot.slane %v4773_v41, %v4352_v7 }
 0x119   : > { %v4001_v51 = vpop.f32.mrf.mxu1  ;;  %v4818_v12 = vcombine.high %v4792_v52, %v4792_v52  ;;  %v4822_v60 = vrot.slane %v4787_v23, %v4352_v7  ;;  %2170 = vrot.lane.b32.xlu0 %v2132_v42, %s4223_s5  ;;  %v4920_v42 = vcombine.high %v4881_v17, %v4881_v17 }
 0x11a   : > { %v3977_v28 = vpop.f32.mrf.mxu0  ;;  %v4866_v51 = vcombine.low %v1777_v39, %v1784_v25  ;;  %v2313_v25 = vrot.slane %v2299_v30, %v4352_v7  ;;  %v4901_v39 = vcombine.high %v4855_v43, %v4855_v43  ;;  %6084 = vst [vmem:[#allocation19_spill] sm:$0xff] %v5051_v22 }
 0x11b   : > { %v4810_v21 = vpop.f32.mrf.mxu1  ;;  %v1794_v28 = vrot.slane %v1786_v40, %v4352_v7  ;;  %v4905_v40 = vcombine.high %v4858_v45, %v4858_v45 }
 0x11c   : > { %v2025_v8 = vadd.f32 %v4866_v51, %v1721_v59  ;;  %v1439_v59 = vcombine.high %v4686_v31, %v4686_v31  ;;  %v2314_v14 = vcombine.low %v2306_v24, %v2313_v25  ;;  %v1991_v24 = vcombine.low %v4920_v42, %v4916_v27 }
 0x11d   : > { %v4004_v33 = vpop.f32.mrf.mxu1  ;;  %v4889_v15 = vcombine.low %v1794_v28, %v1801_v50  ;;  %2666 = vrot.lane.b32.xlu0 %v4866_v51, %s4222_s30  ;;  %v2159_v28 = vrot.slane %v4803_v58, 1  ;;  %v1990_v2 = vcombine.low %v4905_v40, %v4881_v17  ;;  %v1643_v31 = vcombine.high %v4773_v41, %v4773_v41 }
 0x11e   : > { %v2161_v33 = vrot.slane %v2119_v3, 1  ;;  %2041 = vst.msk [vmem:[#allocation2 + $0x10] sm:$0xff] %vm1702_vm3, %v2025_v8  ;;  %v4926_v3 = vrot.slane %v1803_v10, %v4352_v7  ;;  %v4936_v8 = vrot.slane %v1422_v53, %v4352_v7  ;;  %v4954_v53 = vrot.slane %v1439_v59, %v4352_v7 }
 0x11f   : > { %v4851_v46 = vpop.f32.mrf.mxu1  ;;  %2668 = vrot.lane.b32.xlu1 %v4889_v15, %s4222_s30  ;;  %v2026_v11 = vadd.f32 %v4889_v15, %v1722_v56  ;;  %v2315_v56 = vcombine.low %v4724_v20, %v4757_v6  ;;  %v4986_v59 = vcombine.high %v4916_v27, %v4916_v27  ;;  %v4990_v20 = vcombine.high %v4951_v37, %v4951_v37 }
 0x120   : > { %v4943_v10 = vsel %vm2127_vm4, %v2159_v28, %v2161_v33  ;;  %v1438_v25 = vcombine.high %v4936_v8, %v4936_v8  ;;  %v2158_v33 = vrot.slane %v4708_v49, 1  ;;  %v4994_v6 = vcombine.high %v4954_v53, %v4954_v53 }
 0x121   : > { %v4007_v0 = vpop.f32.mrf.mxu1  ;;  %2042 = vst.msk [vmem:[#allocation2 + $0x18] sm:$0xff] %vm1702_vm3, %v2026_v11  ;;  %6076 = vst [vmem:[#allocation12_spill] sm:$0xff] %v4943_v10  ;;  %2540 = vrot.lane.b32.xlu0 %v2314_v14, %s4221_s27  ;;  %v1981_v11 = vrot.slane %v1973_v54, %v4352_v7  ;;  %v4999_v47 = vrot.slane %v1643_v31, %v4352_v7  ;;  %v2323_v31 = vrot.slane %v2315_v56, %v4352_v7 }
 0x122   : > { %v4929_v0 = vrot.slane %v1804_v48, %v4352_v7  ;;  %v1974_v48 = vcombine.low %v4901_v39, %v4858_v45  ;;  %v4982_v54 = vsel %vm2127_vm4, %v2158_v33, %v2159_v28  ;;  %6080 = vst [vmem:[#allocation16_spill] sm:$0xff] %v4994_v6  ;;  %v1998_v28 = vrot.slane %v1990_v2, %v4352_v7 }
 0x123   : > { %v4891_v38 = vpop.f32.mrf.mxu1  ;;  %2194 = vrot.lane.b32.xlu1 %v4943_v10, %s4223_s5  ;;  %6079 = vst [vmem:[#allocation15_spill] sm:$0xff] %v4982_v54  ;;  %6081 = vst [vmem:[#allocation17_spill] sm:$0xff] %v4999_v47  ;;  %v2005_v33 = vrot.slane %v1991_v24, %v4352_v7  ;;  %v5006_v29 = vcombine.low %v1438_v25, %v4951_v37  ;;  %v6082_v2 = vcombine.low %v4764_v26, %v4799_v55 }
 0x124   : > { %v1988_v25 = vrot.slane %v1974_v48, %v4352_v7  ;;  %v5028_v18 = vrot.slane %v4810_v21, %v4352_v7  ;;  %v1854_v26 = vcombine.low %v4994_v6, %v4979_v5  ;;  %v5041_v48 = vcombine.high %v4999_v47, %v4999_v47 }
 0x125   : > { %v4010_v30 = vpop.f32.mrf.mxu1  ;;  %2904 = vrot.lane.b32.xlu0 %v2314_v14, %s4224_s6  ;;  %v2330_v24 = vrot.slane %v6082_v2, %v4352_v7  ;;  %v1660_v14 = vcombine.high %v4810_v21, %v4810_v21  ;;  %v1507_v2 = vcombine.high %v4787_v23, %v4787_v23  ;;  %v5060_v5 = vrot.slane %v4721_v62, %v4352_v7 }
 0x126   : > { %v4940_v30 = vcombine.high %v4895_v19, %v4895_v19  ;;  %6083 = vst [vmem:[#allocation18_spill] sm:$0xff] %v5041_v48  ;;  %v5067_v6 = vrot.slane %v1473_v1, %v4352_v7  ;;  %v5069_v41 = vcombine.low %v1981_v11, %v1988_v25  ;;  %v5086_v1 = vrot.slane %v4851_v46, %v4352_v7 }
 0x127   : > { %2794 = vrot.lane.b32.xlu1 %v4982_v54, %s4225_s8  ;;  %v5054_v23 = vrot.slane %v1660_v14, %v4352_v7  ;;  %v2331_v21 = vcombine.low %v2323_v31, %v2330_v24  ;;  %v5079_v62 = vrot.slane %v1507_v2, %v4352_v7  ;;  %v1677_v31 = vcombine.high %v4851_v46, %v4851_v46 }
 0x128   : > { %v1821_v50 = vcombine.low %v4895_v19, %v4940_v30  ;;  %6085 = vst [vmem:[#allocation20_spill] sm:$0xff] %v5069_v41  ;;  %v2133_v11 = vrot.slane %v4866_v51, 1  ;;  %v2134_v24 = vrot.slane %v4889_v15, 1  ;;  %v5094_v25 = vcombine.high %v5051_v22, %v5051_v22  ;;  %v1730_v15 = vld [vmem:[#allocation2 + $0x58] sm:$0xff] }
 0x129   : > { %2192 = vrot.lane.b32.xlu0 %v4982_v54, %s4223_s5  ;;  %v5103_v46 = vcombine.high %v5086_v1, %v5086_v1  ;;  %v5109_v51 = vrot.slane %v4891_v38, %v4352_v7  ;;  %v5113_v54 = vrot.slane %v4751_v44, %v4352_v7  ;;  %v2084_v14 = vrot.slane %v4799_v55, %v4352_v7 }
 0x12a   : > { %v5031_v56 = vrot.slane %v1821_v50, %v4352_v7  ;;  %v2888_v50 = vcombine.low %v5041_v48, %v5028_v18  ;;  %6088 = vst [vmem:[#allocation23_spill] sm:$0xff] %v5094_v25  ;;  %v2503_v37 = vcombine.low %v4858_v45, %v4905_v40  ;;  %v2887_v55 = vcombine.low %v5094_v25, %v4999_v47 }
 0x12b   : > { %2796 = vrot.lane.b32.xlu1 %v4943_v10, %s4225_s8  ;;  %v5056_v10 = vcombine.low %v1998_v28, %v2005_v33  ;;  %v5073_v28 = vcombine.high %v5054_v23, %v5054_v23  ;;  %v5076_v33 = vrot.slane %v1854_v26, %v4352_v7  ;;  %v5099_v26 = vrot.slane %v1677_v31, %v4352_v7 }
 0x12c   : > { %v1522_v31 = vcombine.high %v4822_v60, %v4822_v60  ;;  %v5131_v44 = vcombine.high %v5109_v51, %v5109_v51  ;;  %v5137_v45 = vcombine.high %v5079_v62, %v5079_v62  ;;  %v2333_v40 = vcombine.low %v4844_v36, %v4837_v57 }
 0x12d   : > { %6086 = vst [vmem:[#allocation21_spill] sm:$0xff] %v5073_v28  ;;  %6087 = vst [vmem:[#allocation22_spill] sm:$0xff] %v5076_v33  ;;  %2690 = vrot.lane.b32.xlu0 %v5069_v41, %s4222_s30  ;;  %v3001_v2 = vcombine.low %v5073_v28, %v5086_v1  ;;  %v5127_v48 = vcombine.high %v5099_v26, %v5099_v26  ;;  %v2902_v38 = vrot.slane %v2888_v50, %v4352_v7 }
 0x12e   : > { %v2034_v22 = vadd.f32 %v4655_v4, %v1730_v15  ;;  %v2135_v28 = vsel %vm2127_vm4, %v2133_v11, %v2134_v24  ;;  %v2136_v33 = vrot.slane %v2084_v14, 1  ;;  %v2895_v50 = vrot.slane %v2887_v55, %v4352_v7 }
 0x12f   : > { %2542 = vrot.lane.b32.xlu1 %v2331_v21, %s4221_s27  ;;  %v6089_v11 = vcombine.low %v4855_v43, %v4901_v39  ;;  %v2517_v15 = vrot.slane %v2503_v37, %v4352_v7  ;;  %v1626_v25 = vcombine.high %v4736_v16, %v4736_v16  ;;  %v2347_v36 = vrot.slane %v2333_v40, %v4352_v7 }
 0x130   : > { %2050 = vst.msk [vmem:[#allocation2 + $0x58] sm:$0xff] %vm1702_vm3, %v2034_v22  ;;  %v6090_v22 = vcombine.low %v4832_v34, %v4807_v63  ;;  %v2126_v47 = vrot.slane %v4986_v59, %v4352_v7  ;;  %v5177_v4 = vcombine.low %v2895_v50, %v2902_v38  ;;  %v5181_v43 = vcombine.high %v5067_v6, %v5067_v6  ;;  %v1732_v50 = vld [vmem:[#allocation2 + $0x68] sm:$0xff] }
 0x131   : > { %2906 = vrot.lane.b32.xlu0 %v2331_v21, %s4224_s6  ;;  %v1675_v21 = vcombine.high %v5028_v18, %v5028_v18  ;;  %v2510_v14 = vrot.slane %v6089_v11, %v4352_v7  ;;  %v5185_v39 = vcombine.high %v5113_v54, %v5113_v54  ;;  %v6091_v63 = vcombine.low %v4881_v17, %v4920_v42 }
 0x132   : > { %v2340_v55 = vrot.slane %v6090_v22, %v4352_v7  ;;  %v2137_v38 = vsel %vm2127_vm4, %v2134_v24, %v2136_v33  ;;  %v5202_v17 = vrot.slane %v4736_v16, %v4352_v7  ;;  %v5205_v42 = vrot.slane %v1626_v25, %v4352_v7 }
 0x133   : > { %3054 = vrot.lane.b32.xlu1 %v5069_v41, %s4226_s9  ;;  %v2520_v41 = vcombine.low %v4916_v27, %v4986_v59  ;;  %v5159_v27 = vcombine.high %v5060_v5, %v5060_v5  ;;  %v2527_v34 = vrot.slane %v6091_v63, %v4352_v7  ;;  %v1906_v59 = vcombine.low %v5137_v45, %v4579_v13 }
 0x134   : > { %v3000_v40 = vcombine.low %v1675_v21, %v5054_v23  ;;  %v5198_v11 = vcombine.low %v2510_v14, %v2517_v15  ;;  %v2166_v33 = vrot.slane %v2126_v47, 1  ;;  %v6092_v24 = vcombine.low %v4837_v57, %v4875_v32  ;;  %v1731_v15 = vld [vmem:[#allocation2 + $0x60] sm:$0xff] }
 0x135   : > { %2774 = vrot.lane.b32.xlu0 %v2135_v28, %s4225_s8  ;;  %v2534_v37 = vrot.slane %v2520_v41, %v4352_v7  ;;  %v3015_v41 = vrot.slane %v3001_v2, %v4352_v7  ;;  %v2164_v25 = vrot.slane %v5056_v10, 1  ;;  %v6093_v2 = vcombine.low %v4990_v20, %v4954_v53 }
 0x136   : > { %v1828_v21 = vrot.slane %v6092_v24, %v4352_v7  ;;  %v3008_v14 = vrot.slane %v3000_v40, %v4352_v7  ;;  %v5226_v47 = vcombine.low %v4926_v3, %v4929_v0  ;;  %v6094_v63 = vcombine.low %v4818_v12, %v4822_v60 }
 0x137   : > { %2172 = vrot.lane.b32.xlu1 %v2135_v28, %s4223_s5  ;;  %v1905_v28 = vcombine.low %v1522_v31, %v5079_v62  ;;  %v5209_v31 = vcombine.low %v2340_v55, %v2347_v36  ;;  %v5216_v16 = vcombine.low %v2527_v34, %v2534_v37  ;;  %v1852_v22 = vrot.slane %v6093_v2, %v4352_v7  ;;  %v1733_v2 = vld [vmem:[#allocation2 + $0x70] sm:$0xff] }
 0x138   : > { %v2036_v36 = vadd.f32 %v4803_v58, %v1732_v50  ;;  %v5228_v57 = vcombine.low %v3008_v14, %v3015_v41  ;;  %v2417_v55 = vcombine.low %v5185_v39, %v4792_v52  ;;  %v2432_v34 = vrot.slane %v6094_v63, %v4352_v7  ;;  %v1734_v41 = vld [vmem:[#allocation2 + $0x78] sm:$0xff]  ;;  %v1725_v63 = vld [vmem:[#allocation2 + $0x30] sm:$0xff] }
 0x139   : > { %2776 = vrot.lane.b32.xlu0 %v2137_v38, %s4225_s8  ;;  %v2350_v37 = vcombine.low %v4940_v30, %v4936_v8  ;;  %v6095_v3 = vcombine.low %v4875_v32, %v4895_v19  ;;  %v2035_v50 = vadd.f32 %v4708_v49, %v1731_v15  ;;  %v5255_v30 = vsel %vm2127_vm4, %v2164_v25, %v2166_v33 }
 0x13a   : > { %2052 = vst.msk [vmem:[#allocation2 + $0x68] sm:$0xff] %vm1702_vm3, %v2036_v36  ;;  %v5258_v32 = vcombine.low %v1828_v21, %v5031_v56  ;;  %v2425_v19 = vrot.slane %v2417_v55, %v4352_v7  ;;  %v2434_v24 = vcombine.low %v5079_v62, %v5137_v45  ;;  %v6097_v49 = vrot.slane %v5006_v29, %v4352_v7  ;;  %v1724_v36 = vld [vmem:[#allocation2 + $0x28] sm:$0xff] }
 0x13b   : > { %2174 = vrot.lane.b32.xlu1 %v2137_v38, %s4223_s5  ;;  %v2357_v0 = vrot.slane %v6095_v3, %v4352_v7  ;;  %v6096_v38 = vcombine.low %v5021_v35, %v5010_v61  ;;  %2051 = vst.msk [vmem:[#allocation2 + $0x60] sm:$0xff] %vm1702_vm3, %v2035_v50  ;;  %v6098_v33 = vcombine.low %v4579_v13, %v4583_v9  ;;  %v1726_v50 = vld [vmem:[#allocation2 + $0x38] sm:$0xff] }
 0x13c   : > { %v5266_v14 = vcombine.low %v6097_v49, %v1852_v22  ;;  %v1913_v56 = vrot.slane %v1905_v28, %v4352_v7  ;;  %v1920_v21 = vrot.slane %v1906_v59, %v4352_v7  ;;  %v5275_v55 = vcombine.low %v2425_v19, %v2432_v34  ;;  %v1723_v22 = vld [vmem:[#allocation2 + $0x20] sm:$0xff]  ;;  %v6100_v28 = vld [vmem:[#allocation22_spill] sm:$0xff] }
 0x13d   : > { %v1869_v40 = vrot.slane %v6096_v38, %v4352_v7  ;;  %2564 = vrot.lane.b32.xlu0 %v5198_v11, %s4221_s27  ;;  %v2449_v15 = vrot.slane %v6098_v33, %v4352_v7  ;;  %v2442_v62 = vrot.slane %v2434_v24, %v4352_v7  ;;  %v2038_v29 = vadd.f32 %v5056_v10, %v1734_v41  ;;  %v1729_v41 = vld [vmem:[#allocation2 + $0x50] sm:$0xff] }
 0x13e   : > { %v3017_v45 = vcombine.low %v5103_v46, %v5099_v26  ;;  %v6099_v13 = vcombine.low %v5086_v1, %v5103_v46  ;;  %v5292_v34 = vcombine.low %v1913_v56, %v1920_v21  ;;  %v6101_v3 = vcombine.low %v5127_v48, %v5109_v51  ;;  %v6102_v46 = vld [vmem:[#allocation20_spill] sm:$0xff]  ;;  %v6103_v56 = vld [vmem:[#allocation21_spill] sm:$0xff] }
 0x13f   : > { %2908 = vrot.lane.b32.xlu1 %v5209_v31, %s4224_s6  ;;  %v5290_v59 = vcombine.low %v6100_v28, %v1869_v40  ;;  %v5300_v19 = vcombine.low %v2442_v62, %v2449_v15  ;;  %2054 = vst.msk [vmem:[#allocation2 + $0x78] sm:$0xff] %vm1702_vm3, %v2038_v29  ;;  %v2037_v40 = vadd.f32 %v6102_v46, %v1733_v2  ;;  %v3137_v62 = vrot.slane %v5228_v57, 1 }
 0x140   : > { %v5287_v9 = vrot.slane %v6099_v13, %v4352_v7  ;;  %v3032_v38 = vrot.slane %v6101_v3, %v4352_v7  ;;  %v3025_v1 = vrot.slane %v3017_v45, %v4352_v7  ;;  %v2028_v24 = vadd.f32 %v5258_v32, %v1724_v36 }
 0x141   : > { %2928 = vrot.lane.b32.xlu0 %v5198_v11, %s4224_s6  ;;  %v2364_v49 = vrot.slane %v2350_v37, %v4352_v7  ;;  %v2027_v33 = vadd.f32 %v5226_v47, %v1723_v22  ;;  %v6104_v21 = vcombine.low %v5054_v23, %v6103_v56  ;;  %v2029_v15 = vadd.f32 %v5266_v14, %v1725_v63 }
 0x142   : > { %v5316_v29 = vcombine.low %v3025_v1, %v3032_v38  ;;  %2053 = vst.msk [vmem:[#allocation2 + $0x70] sm:$0xff] %vm1702_vm3, %v2037_v40  ;;  %2044 = vst.msk [vmem:[#allocation2 + $0x28] sm:$0xff] %vm1702_vm3, %v2028_v24  ;;  %v2030_v37 = vadd.f32 %v5290_v59, %v1726_v50  ;;  %v2033_v2 = vadd.f32 %v5292_v34, %v1729_v41 }
 0x143   : > { %2566 = vrot.lane.b32.xlu1 %v5216_v16, %s4221_s27  ;;  %v5312_v13 = vrot.slane %v6104_v21, %v4352_v7  ;;  %2043 = vst.msk [vmem:[#allocation2 + $0x20] sm:$0xff] %vm1702_vm3, %v2027_v33  ;;  %2045 = vst.msk [vmem:[#allocation2 + $0x30] sm:$0xff] %vm1702_vm3, %v2029_v15  ;;  %v1871_v36 = vcombine.low %v5060_v5, %v5159_v27  ;;  %v1872_v45 = vcombine.low %v5067_v6, %v5181_v43 }
 0x144   : > { %v3138_v22 = vrot.slane %v5316_v29, 1  ;;  %2046 = vst.msk [vmem:[#allocation2 + $0x38] sm:$0xff] %vm1702_vm3, %v2030_v37  ;;  %2049 = vst.msk [vmem:[#allocation2 + $0x50] sm:$0xff] %vm1702_vm3, %v2033_v2  ;;  %v1641_v63 = vcombine.high %v5202_v17, %v5202_v17  ;;  %v1642_v28 = vcombine.high %v5205_v42, %v5205_v42  ;;  %v5341_v3 = vcombine.low %v2357_v0, %v2364_v49  ;;  %v1727_v37 = vld [vmem:[#allocation2 + $0x40] sm:$0xff] }
 0x145   : > { %v3254_v23 = vcombine.low %v5312_v13, %v5287_v9  ;;  %2544 = vrot.lane.b32.xlu0 %v5209_v31, %s4221_s27  ;;  %v1879_v38 = vrot.slane %v1871_v36, %v4352_v7  ;;  %v1886_v50 = vrot.slane %v1872_v45, %v4352_v7  ;;  %v1888_v0 = vcombine.low %v5113_v54, %v5185_v39 }
 0x146   : > { %v5344_v5 = vsel %vm2127_vm4, %v3137_v62, %v3138_v22  ;;  %v2632_v41 = vcombine.low %v5202_v17, %v1641_v63  ;;  %v2633_v1 = vcombine.low %v5205_v42, %v1642_v28  ;;  %v1889_v40 = vcombine.low %v4792_v52, %v4818_v12  ;;  %v6106_v12 = vld [vmem:[#allocation19_spill] sm:$0xff] }
 0x147   : > { %2198 = vrot.lane.b32.xlu1 %v5255_v30, %s4223_s5  ;;  %v3136_v24 = vrot.slane %v5131_v44, %v4352_v7  ;;  %v6105_v17 = vcombine.low %v5109_v51, %v5131_v44  ;;  %v5370_v33 = vcombine.low %v1879_v38, %v1886_v50  ;;  %v2870_v52 = vcombine.low %v1641_v63, %v5205_v42  ;;  %v1728_v50 = vld [vmem:[#allocation2 + $0x48] sm:$0xff] }
 0x148   : > { %v2640_v39 = vrot.slane %v2632_v41, %v4352_v7  ;;  %v2871_v56 = vcombine.low %v1642_v28, %v6106_v12  ;;  %v2647_v21 = vrot.slane %v2633_v1, %v4352_v7  ;;  %v1896_v15 = vrot.slane %v1888_v0, %v4352_v7 }
 0x149   : > { %2670 = vrot.lane.b32.xlu0 %v5226_v47, %s4222_s30  ;;  %v5368_v49 = vrot.slane %v6105_v17, %v4352_v7  ;;  %v1903_v62 = vrot.slane %v1889_v40, %v4352_v7  ;;  %v6107_v51 = vcombine.low %v5099_v26, %v5127_v48  ;;  %v3140_v42 = vrot.slane %v3136_v24, 1  ;;  %v6108_v17 = vld [vmem:[#allocation23_spill] sm:$0xff] }
 0x14a   : > { %v2031_v36 = vadd.f32 %v5370_v33, %v1727_v37  ;;  %v5391_v45 = vcombine.low %v2640_v39, %v2647_v21  ;;  %v2878_v63 = vrot.slane %v2870_v52, %v4352_v7  ;;  %v2885_v48 = vrot.slane %v2871_v56, %v4352_v7  ;;  %v6109_v52 = vld [vmem:[#allocation18_spill] sm:$0xff] }
 0x14b   : > { %2546 = vrot.lane.b32.xlu1 %v5341_v3, %s4221_s27  ;;  %v5382_v44 = vrot.slane %v6107_v51, %v4352_v7  ;;  %v5395_v26 = vcombine.low %v1896_v15, %v1903_v62  ;;  %v2091_v28 = vrot.slane %v4936_v8, %v4352_v7  ;;  %v2163_v38 = vrot.slane %v6102_v46, 1  ;;  %v6111_v51 = vld [vmem:[#allocation13_spill] sm:$0xff] }
 0x14c   : > { %2047 = vst.msk [vmem:[#allocation2 + $0x40] sm:$0xff] %vm1702_vm3, %v2031_v36  ;;  %v5406_v41 = vsel %vm2127_vm4, %v3138_v22, %v3140_v42  ;;  %v5409_v0 = vcombine.low %v2878_v63, %v2885_v48  ;;  %v2139_v46 = vrot.slane %v5258_v32, 1  ;;  %v2138_v24 = vrot.slane %v5226_v47, 1  ;;  %v6112_v36 = vld [vmem:[#allocation16_spill] sm:$0xff] }
 0x14d   : > { %2692 = vrot.lane.b32.xlu0 %v5056_v10, %s4222_s30  ;;  %v2032_v1 = vadd.f32 %v5395_v26, %v1728_v50  ;;  %v2141_v40 = vrot.slane %v2091_v28, 1  ;;  %v5415_v8 = vsel %vm2127_vm4, %v2163_v38, %v2164_v25  ;;  %v2649_v39 = vcombine.low %v6106_v12, %v6108_v17 }
 0x14e   : > { %v5431_v25 = vsel %vm2127_vm4, %v2138_v24, %v2139_v46  ;;  %v2366_v37 = vcombine.low %v6111_v51, %v4990_v20  ;;  %v2066_v20 = vld [vmem:[#allocation2 + $0x58] sm:$0xff] }
 0x14f   : > { %2672 = vrot.lane.b32.xlu1 %v5258_v32, %s4222_s30  ;;  %2048 = vst.msk [vmem:[#allocation2 + $0x48] sm:$0xff] %vm1702_vm3, %v2032_v1  ;;  %v5423_v22 = vsel %vm2127_vm4, %v2139_v46, %v2141_v40  ;;  %v2657_v21 = vrot.slane %v2649_v39, %v4352_v7  ;;  %v6113_v40 = vld [vmem:[#allocation14_spill] sm:$0xff] }
 0x150   : > { %v2374_v48 = vrot.slane %v2366_v37, %v4352_v7  ;;  %v2383_v46 = vcombine.low %v6113_v40, %v5021_v35 }
 0x151   : > { %3034 = vrot.lane.b32.xlu0 %v5226_v47, %s4226_s9  ;;  %v6110_v47 = vld [vmem:[#allocation17_spill] sm:$0xff] }
 0x152   : > { %v2650_v56 = vcombine.low %v6110_v47, %v6109_v52  ;;  %v2768_v52 = vrot.slane %v5028_v18, %v4352_v7  ;;  %v2391_v35 = vrot.slane %v2383_v46, %v4352_v7 }
 0x153   : > { %2910 = vrot.lane.b32.xlu1 %v5341_v3, %s4224_s6 }
 0x154   : > { %v2664_v15 = vrot.slane %v2650_v56, %v4352_v7 }
 0x155   : > { %2930 = vrot.lane.b32.xlu0 %v5216_v16, %s4224_s6 }
 0x156   : > { %v5453_v62 = vcombine.low %v2657_v21, %v2664_v15  ;;  %v2769_v21 = vrot.slane %v5391_v45, 1 }
 0x157   : > { %2694 = vrot.lane.b32.xlu1 %v5391_v45, %s4222_s30 }
 0x159   : > { %2196 = vrot.lane.b32.xlu0 %v5415_v8, %s4223_s5 }
 0x15b   : > { %2932 = vrot.lane.b32.xlu1 %v5409_v0, %s4224_s6 }
 0x15d   : > { %2798 = vrot.lane.b32.xlu0 %v5415_v8, %s4225_s8 }
 0x15f   : > { %2178 = vrot.lane.b32.xlu1 %v5423_v22, %s4223_s5 }
 0x161   : > { %2800 = vrot.lane.b32.xlu0 %v5255_v30, %s4225_s8 }
 0x163   : > { %2778 = vrot.lane.b32.xlu1 %v5431_v25, %s4225_s8 }
 0x165   : > { %3036 = vrot.lane.b32.xlu0 %v5258_v32, %s4226_s9  ;;  %v2367_v32 = vcombine.low %v4954_v53, %v6112_v36  ;;  %v1472_v53 = vcombine.high %v5010_v61, %v5010_v61  ;;  %v2772_v36 = vrot.slane %v2768_v52, 1 }
 0x167   : > { %2780 = vrot.lane.b32.xlu1 %v5423_v22, %s4225_s8  ;;  %v2381_v28 = vrot.slane %v2367_v32, %v4352_v7  ;;  %v2384_v17 = vcombine.low %v5010_v61, %v1472_v53  ;;  %v2770_v61 = vrot.slane %v5453_v62, 1 }
 0x169   : > { %3058 = vrot.lane.b32.xlu0 %v5391_v45, %s4226_s9  ;;  %v5478_v24 = vcombine.low %v2374_v48, %v2381_v28  ;;  %v2398_v56 = vrot.slane %v2384_v17, %v4352_v7  ;;  %v5504_v37 = vsel %vm2127_vm4, %v2769_v21, %v2770_v61  ;;  %v2143_v45 = vrot.slane %v5266_v14, 1 }
 0x16a   : > { %v5451_v12 = vpop.permute.xlu0 %2536  ;;  %v2144_v48 = vrot.slane %v5290_v59, 1 }
 0x16b   : > { %3038 = vrot.lane.b32.xlu1 %v5266_v14, %s4226_s9  ;;  %v5501_v18 = vcombine.low %v2391_v35, %v2398_v56 }
 0x16c   : > { %v2559_v42 = vpop.permute.xlu1 %2558 }
 0x16d   : > { %2176 = vrot.lane.b32.xlu0 %v5431_v25, %s4223_s5 }
 0x16e   : > { %v5463_v63 = vpop.permute.xlu0 %2684 }
 0x16f   : > { %2696 = vrot.lane.b32.xlu1 %v5453_v62, %s4222_s30 }
 0x170   : > { %v2191_v38 = vpop.permute.xlu1 %2190 }
 0x171   : > { %2674 = vrot.lane.b32.xlu0 %v5266_v14, %s4222_s30  ;;  %v2227_v50 = vadd.f32 %v2191_v38, %v2066_v20  ;;  %v5518_v38 = vsel %vm2127_vm4, %v2770_v61, %v2772_v36  ;;  %v2098_v14 = vrot.slane %v1472_v53, %v4352_v7  ;;  %v2056_v36 = vld [vmem:[#allocation2 + $0x8] sm:$0xff] }
 0x172   : > { %v5473_v1 = vpop.permute.xlu0 %2922 }
 0x173   : > { %2934 = vrot.lane.b32.xlu1 %v5177_v4, %s4224_s6  ;;  %2243 = vst.msk [vmem:[#allocation2 + $0x58] sm:$0xff] %vm1702_vm3, %v2227_v50  ;;  %v2401_v50 = vcombine.low %v5181_v43, %v5113_v54  ;;  %v2146_v52 = vrot.slane %v2098_v14, 1  ;;  %v2055_v43 = vld [vmem:[#allocation2] sm:$0xff] }
 0x174   : > { %v5483_v39 = vpop.permute.xlu1 %2538 }
 0x175   : > { %2548 = vrot.lane.b32.xlu0 %v5478_v24, %s4221_s27  ;;  %v2415_v54 = vrot.slane %v2401_v50, %v4352_v7  ;;  %v5544_v21 = vsel %vm2127_vm4, %v2144_v48, %v2146_v52  ;;  %v2068_v50 = vld [vmem:[#allocation2 + $0x68] sm:$0xff] }
 0x176   : > { %v5489_v47 = vpop.permute.xlu0 %2792 }
 0x177   : > { %2676 = vrot.lane.b32.xlu1 %v5290_v59, %s4222_s30 }
 0x178   : > { %v5497_v15 = vpop.permute.xlu1 %2686 }
 0x179   : > { %2912 = vrot.lane.b32.xlu0 %v5478_v24, %s4224_s6 }
 0x17a   : > { %v2259_v51 = vld [vmem:[#allocation2 + $0x58] sm:$0xff]  ;;  %v5512_v28 = vpop.permute.xlu0 %2560 }
 0x17b   : > { %3040 = vrot.lane.b32.xlu1 %v5290_v59, %s4226_s9  ;;  %v2595_v32 = vadd.f32 %v2559_v42, %v2259_v51  ;;  %v5521_v42 = vsel %vm2127_vm4, %v2143_v45, %v2144_v48  ;;  %v2400_v59 = vcombine.low %v5159_v27, %v5067_v6 }
 0x17c   : > { %v5514_v20 = vpop.permute.xlu1 %2924 }
 0x17d   : > { %2914 = vrot.lane.b32.xlu0 %v5501_v18, %s4224_s6  ;;  %2611 = vst.msk [vmem:[#allocation2 + $0x58] sm:$0xff] %vm1702_vm3, %v2595_v32  ;;  %v2408_v6 = vrot.slane %v2400_v59, %v4352_v7 }
 0x17e   : > { %v5532_v40 = vpop.permute.xlu0 %3050 }
 0x17f   : > { %2802 = vrot.lane.b32.xlu1 %v5504_v37, %s4225_s8  ;;  %v5552_v51 = vcombine.low %v2408_v6, %v2415_v54  ;;  %v2148_v6 = vrot.slane %v5370_v33, 1  ;;  %v2149_v54 = vrot.slane %v5395_v26, 1 }
 0x180   : > { %v5534_v46 = vpop.permute.xlu1 %2562 }
 0x181   : > { %2180 = vrot.lane.b32.xlu0 %v5521_v42, %s4223_s5 }
 0x182   : > { %v2169_v35 = vpop.permute.xlu0 %2168 }
 0x183   : > { %2804 = vrot.lane.b32.xlu1 %v5518_v38, %s4225_s8  ;;  %v2216_v56 = vadd.f32 %v2169_v35, %v2055_v43  ;;  %v2105_v35 = vrot.slane %v4822_v60, %v4352_v7 }
 0x184   : > { %v2627_v17 = vld [vmem:[#allocation2 + $0x58] sm:$0xff]  ;;  %v2689_v53 = vpop.permute.xlu1 %2688 }
 0x185   : > { %2782 = vrot.lane.b32.xlu0 %v5521_v42, %s4225_s8  ;;  %v2725_v27 = vadd.f32 %v2689_v53, %v2627_v17  ;;  %2232 = vst.msk [vmem:[#allocation2] sm:$0xff] %vm1702_vm3, %v2216_v56  ;;  %v2151_v60 = vrot.slane %v2105_v35, 1 }
 0x187   : > { %2550 = vrot.lane.b32.xlu1 %v5501_v18, %s4221_s27  ;;  %2741 = vst.msk [vmem:[#allocation2 + $0x58] sm:$0xff] %vm1702_vm3, %v2725_v27 }
 0x188   : > { %v5550_v61 = vpop.permute.xlu1 %2926 }
 0x189   : > { %2784 = vrot.lane.b32.xlu0 %v5544_v21, %s4225_s8 }
 0x18b   : > { %3062 = vrot.lane.b32.xlu1 %v5228_v57, %s4226_s9  ;;  %v2171_v32 = vpop.permute.xlu0 %2170 }
 0x18c   : > { %v2217_v45 = vadd.f32 %v2171_v32, %v2056_v36  ;;  %v2248_v14 = vld [vmem:[#allocation2] sm:$0xff]  ;;  %v5584_v36 = vsel %vm2127_vm4, %v2148_v6, %v2149_v54 }
 0x18d   : > { %2552 = vrot.lane.b32.xlu0 %v5552_v51, %s4221_s27  ;;  %v2584_v59 = vadd.f32 %v5451_v12, %v2248_v14 }
 0x18e   : > { %2233 = vst.msk [vmem:[#allocation2 + $0x8] sm:$0xff] %vm1702_vm3, %v2217_v45  ;;  %v2067_v45 = vld [vmem:[#allocation2 + $0x60] sm:$0xff] }
 0x18f   : > { %2182 = vrot.lane.b32.xlu1 %v5544_v21, %s4223_s5  ;;  %v2667_v48 = vpop.permute.xlu0 %2666  ;;  %2600 = vst.msk [vmem:[#allocation2] sm:$0xff] %vm1702_vm3, %v2584_v59 }
 0x191   : > { %v2669_v57 = vpop.permute.xlu1 %2668  ;;  %2678 = vrot.lane.b32.xlu0 %v5370_v33, %s4222_s30 }
 0x193   : > { %2916 = vrot.lane.b32.xlu1 %v5552_v51, %s4224_s6  ;;  %v5565_v52 = vpop.permute.xlu0 %2540 }
 0x195   : > { %v2195_v17 = vpop.permute.xlu1 %2194  ;;  %v2249_v27 = vld [vmem:[#allocation2 + $0x8] sm:$0xff]  ;;  %3042 = vrot.lane.b32.xlu0 %v5370_v33, %s4226_s9  ;;  %v2757_v33 = vld [vmem:[#allocation2 + $0x58] sm:$0xff] }
 0x196   : > { %v2229_v53 = vadd.f32 %v2195_v17, %v2068_v50  ;;  %v2585_v12 = vadd.f32 %v5483_v39, %v2249_v27  ;;  %v2616_v32 = vld [vmem:[#allocation2] sm:$0xff] }
 0x197   : > { %2554 = vrot.lane.b32.xlu1 %v5275_v55, %s4221_s27  ;;  %v5580_v56 = vpop.permute.xlu0 %2904  ;;  %v2714_v50 = vadd.f32 %v2667_v48, %v2616_v32  ;;  %v5599_v48 = vsel %vm2127_vm4, %v2149_v54, %v2151_v60  ;;  %v2153_v54 = vrot.slane %v5292_v34, 1 }
 0x198   : > { %2245 = vst.msk [vmem:[#allocation2 + $0x68] sm:$0xff] %vm1702_vm3, %v2229_v53  ;;  %2601 = vst.msk [vmem:[#allocation2 + $0x8] sm:$0xff] %vm1702_vm3, %v2585_v12 }
 0x199   : > { %v5576_v43 = vpop.permute.xlu1 %2794  ;;  %2184 = vrot.lane.b32.xlu0 %v5584_v36, %s4223_s5  ;;  %2730 = vst.msk [vmem:[#allocation2] sm:$0xff] %vm1702_vm3, %v2714_v50 }
 0x19b   : > { %2680 = vrot.lane.b32.xlu1 %v5395_v26, %s4222_s30  ;;  %v2193_v14 = vpop.permute.xlu0 %2192 }
 0x19c   : > { %v2228_v17 = vadd.f32 %v2193_v14, %v2067_v45 }
 0x19d   : > { %v2797_v39 = vpop.permute.xlu1 %2796  ;;  %2556 = vrot.lane.b32.xlu0 %v5300_v19, %s4221_s27 }
 0x19e   : > { %v2833_v59 = vadd.f32 %v2797_v39, %v2757_v33  ;;  %2244 = vst.msk [vmem:[#allocation2 + $0x60] sm:$0xff] %vm1702_vm3, %v2228_v17 }
 0x19f   : > { %2918 = vrot.lane.b32.xlu1 %v5275_v55, %s4224_s6  ;;  %v2261_v53 = vld [vmem:[#allocation2 + $0x68] sm:$0xff]  ;;  %v2691_v35 = vpop.permute.xlu0 %2690 }
 0x1a0   : > { %2849 = vst.msk [vmem:[#allocation2 + $0x58] sm:$0xff] %vm1702_vm3, %v2833_v59  ;;  %v2597_v6 = vadd.f32 %v5534_v46, %v2261_v53  ;;  %v2617_v12 = vld [vmem:[#allocation2 + $0x8] sm:$0xff]  ;;  %v2057_v59 = vld [vmem:[#allocation2 + $0x10] sm:$0xff]  ;;  %v2746_v50 = vld [vmem:[#allocation2] sm:$0xff] }
 0x1a1   : > { %v2543_v27 = vpop.permute.xlu1 %2542  ;;  %v2715_v33 = vadd.f32 %v2669_v57, %v2617_v12  ;;  %2682 = vrot.lane.b32.xlu0 %v5292_v34, %s4222_s30  ;;  %v6114_v12 = vld [vmem:[#allocation8_spill] sm:$0xff] }
 0x1a2   : > { %2613 = vst.msk [vmem:[#allocation2 + $0x68] sm:$0xff] %vm1702_vm3, %v2597_v6 }
 0x1a3   : > { %2186 = vrot.lane.b32.xlu1 %v5599_v48, %s4223_s5  ;;  %2731 = vst.msk [vmem:[#allocation2 + $0x8] sm:$0xff] %vm1702_vm3, %v2715_v33  ;;  %v2907_v39 = vpop.permute.xlu0 %2906  ;;  %v6115_v33 = vrot.slane %v6114_v12, 1 }
 0x1a5   : > { %v5607_v46 = vpop.permute.xlu1 %3054  ;;  %v2260_v45 = vld [vmem:[#allocation2 + $0x60] sm:$0xff]  ;;  %2920 = vrot.lane.b32.xlu0 %v5300_v19, %s4224_s6  ;;  %v5621_v2 = vsel %vm2127_vm4, %v2153_v54, %v6115_v33 }
 0x1a6   : > { %v2596_v14 = vadd.f32 %v5512_v28, %v2260_v45  ;;  %v2058_v28 = vld [vmem:[#allocation2 + $0x18] sm:$0xff] }
 0x1a7   : > { %2786 = vrot.lane.b32.xlu1 %v5584_v36, %s4225_s8  ;;  %v2865_v32 = vld [vmem:[#allocation2 + $0x58] sm:$0xff]  ;;  %v2775_v17 = vpop.permute.xlu0 %2774 }
 0x1a8   : > { %v2963_v57 = vadd.f32 %v5550_v61, %v2865_v32  ;;  %2612 = vst.msk [vmem:[#allocation2 + $0x60] sm:$0xff] %vm1702_vm3, %v2596_v14  ;;  %v2822_v6 = vadd.f32 %v2775_v17, %v2746_v50 }
 0x1a9   : > { %v2173_v60 = vpop.permute.xlu1 %2172  ;;  %2188 = vrot.lane.b32.xlu0 %v5621_v2, %s4223_s5 }
 0x1aa   : > { %v2218_v53 = vadd.f32 %v2173_v60, %v2057_v59  ;;  %2979 = vst.msk [vmem:[#allocation2 + $0x58] sm:$0xff] %vm1702_vm3, %v2963_v57  ;;  %2838 = vst.msk [vmem:[#allocation2] sm:$0xff] %vm1702_vm3, %v2822_v6  ;;  %v2747_v32 = vld [vmem:[#allocation2 + $0x8] sm:$0xff] }
 0x1ab   : > { %2788 = vrot.lane.b32.xlu1 %v5599_v48, %s4225_s8  ;;  %v2777_v45 = vpop.permute.xlu0 %2776 }
 0x1ac   : > { %2234 = vst.msk [vmem:[#allocation2 + $0x10] sm:$0xff] %vm1702_vm3, %v2218_v53  ;;  %v2823_v14 = vadd.f32 %v2777_v45, %v2747_v32 }
 0x1ad   : > { %v2175_v61 = vpop.permute.xlu1 %2174  ;;  %3044 = vrot.lane.b32.xlu0 %v5395_v26, %s4226_s9 }
 0x1ae   : > { %v2219_v57 = vadd.f32 %v2175_v61, %v2058_v28  ;;  %2839 = vst.msk [vmem:[#allocation2 + $0x8] sm:$0xff] %vm1702_vm3, %v2823_v14 }
 0x1af   : > { %3046 = vrot.lane.b32.xlu1 %v5292_v34, %s4226_s9  ;;  %v2628_v59 = vld [vmem:[#allocation2 + $0x60] sm:$0xff]  ;;  %v5637_v60 = vpop.permute.xlu0 %2564 }
 0x1b0   : > { %2235 = vst.msk [vmem:[#allocation2 + $0x18] sm:$0xff] %vm1702_vm3, %v2219_v57  ;;  %v2726_v50 = vadd.f32 %v2691_v35, %v2628_v59  ;;  %v2629_v57 = vld [vmem:[#allocation2 + $0x68] sm:$0xff] }
 0x1b1   : > { %v5635_v54 = vpop.permute.xlu1 %2908  ;;  %3052 = vrot.lane.b32.xlu0 %v4803_v58, %s4226_s9  ;;  %v2854_v53 = vld [vmem:[#allocation2] sm:$0xff] }
 0x1b2   : > { %2742 = vst.msk [vmem:[#allocation2 + $0x60] sm:$0xff] %vm1702_vm3, %v2726_v50  ;;  %v2952_v6 = vadd.f32 %v5580_v56, %v2854_v53 }
 0x1b3   : > { %3048 = vrot.lane.b32.xlu1 %v6114_v12, %s4226_s9  ;;  %v2250_v17 = vld [vmem:[#allocation2 + $0x10] sm:$0xff]  ;;  %v5646_v33 = vpop.permute.xlu0 %2928  ;;  %v2070_v12 = vld [vmem:[#allocation2 + $0x78] sm:$0xff] }
 0x1b4   : > { %v2586_v34 = vadd.f32 %v5565_v52, %v2250_v17  ;;  %2968 = vst.msk [vmem:[#allocation2] sm:$0xff] %vm1702_vm3, %v2952_v6  ;;  %v6116_v17 = vld [vmem:[#allocation15_spill] sm:$0xff] }
 0x1b5   : > { %v2567_v26 = vpop.permute.xlu1 %2566  ;;  %3060 = vrot.lane.b32.xlu0 %v5453_v62, %s4226_s9  ;;  %v2855_v52 = vld [vmem:[#allocation2 + $0x8] sm:$0xff] }
 0x1b6   : > { %2602 = vst.msk [vmem:[#allocation2 + $0x10] sm:$0xff] %vm1702_vm3, %v2586_v34  ;;  %v2953_v61 = vadd.f32 %v2907_v39, %v2855_v52 }
 0x1b7   : > { %3056 = vrot.lane.b32.xlu1 %v5056_v10, %s4226_s9  ;;  %v2251_v35 = vld [vmem:[#allocation2 + $0x18] sm:$0xff]  ;;  %v5654_v32 = vpop.permute.xlu0 %2544 }
 0x1b8   : > { %v2587_v58 = vadd.f32 %v2543_v27, %v2251_v35  ;;  %2969 = vst.msk [vmem:[#allocation2 + $0x8] sm:$0xff] %vm1702_vm3, %v2953_v61 }
 0x1b9   : > { %v2199_v28 = vpop.permute.xlu1 %2198  ;;  %3142 = vrot.lane.b32.xlu0 %v5431_v25, %s4227_s10  ;;  %v2758_v61 = vld [vmem:[#allocation2 + $0x60] sm:$0xff] }
 0x1ba   : > { %v2231_v56 = vadd.f32 %v2199_v28, %v2070_v12  ;;  %2603 = vst.msk [vmem:[#allocation2 + $0x18] sm:$0xff] %vm1702_vm3, %v2587_v58  ;;  %v2069_v58 = vld [vmem:[#allocation2 + $0x70] sm:$0xff] }
 0x1bb   : > { %3064 = vrot.lane.b32.xlu1 %v5316_v29, %s4226_s9  ;;  %v2671_v27 = vpop.permute.xlu0 %2670  ;;  %v2984_v34 = vld [vmem:[#allocation2] sm:$0xff] }
 0x1bc   : > { %2247 = vst.msk [vmem:[#allocation2 + $0x78] sm:$0xff] %vm1702_vm3, %v2231_v56 }
 0x1bd   : > { %v2618_v10 = vld [vmem:[#allocation2 + $0x10] sm:$0xff]  ;;  %v5663_v62 = vpop.permute.xlu1 %2546  ;;  %3150 = vrot.lane.b32.xlu0 %v5584_v36, %s4227_s10 }
 0x1be   : > { %v2716_v39 = vadd.f32 %v2671_v27, %v2618_v10 }
 0x1bf   : > { %3146 = vrot.lane.b32.xlu1 %v5521_v42, %s4227_s10  ;;  %v2693_v14 = vpop.permute.xlu0 %2692 }
 0x1c0   : > { %2732 = vst.msk [vmem:[#allocation2 + $0x10] sm:$0xff] %vm1702_vm3, %v2716_v39  ;;  %v2727_v50 = vadd.f32 %v2693_v14, %v2629_v57 }
 0x1c1   : > { %v2619_v29 = vld [vmem:[#allocation2 + $0x18] sm:$0xff]  ;;  %v2673_v45 = vpop.permute.xlu1 %2672  ;;  %3158 = vrot.lane.b32.xlu0 %v6116_v17, %s4227_s10 }
 0x1c2   : > { %v2717_v59 = vadd.f32 %v2673_v45, %v2619_v29  ;;  %2743 = vst.msk [vmem:[#allocation2 + $0x68] sm:$0xff] %vm1702_vm3, %v2727_v50 }
 0x1c3   : > { %3162 = vrot.lane.b32.xlu1 %v5415_v8, %s4227_s10  ;;  %v2263_v25 = vld [vmem:[#allocation2 + $0x78] sm:$0xff]  ;;  %v3035_v53 = vpop.permute.xlu0 %3034 }
 0x1c4   : > { %2733 = vst.msk [vmem:[#allocation2 + $0x18] sm:$0xff] %vm1702_vm3, %v2717_v59  ;;  %v2599_v42 = vadd.f32 %v2567_v26, %v2263_v25  ;;  %v3082_v6 = vadd.f32 %v3035_v53, %v2984_v34  ;;  %v2985_v25 = vld [vmem:[#allocation2 + $0x8] sm:$0xff] }
 0x1c5   : > { %v5676_v36 = vpop.permute.xlu1 %2910  ;;  %3166 = vrot.lane.b32.xlu0 %v5504_v37, %s4227_s10  ;;  %v2060_v37 = vld [vmem:[#allocation2 + $0x28] sm:$0xff] }
 0x1c6   : > { %2615 = vst.msk [vmem:[#allocation2 + $0x78] sm:$0xff] %vm1702_vm3, %v2599_v42  ;;  %3098 = vst.msk [vmem:[#allocation2] sm:$0xff] %vm1702_vm3, %v3082_v6 }
 0x1c7   : > { %3170 = vrot.lane.b32.xlu1 %v5344_v5, %s4227_s10  ;;  %v2931_v26 = vpop.permute.xlu0 %2930  ;;  %v6117_v5 = vld [vmem:[#allocation9_spill] sm:$0xff]  ;;  %v2748_v27 = vld [vmem:[#allocation2 + $0x10] sm:$0xff] }
 0x1c9   : > { %v5684_v8 = vpop.permute.xlu1 %2694  ;;  %2790 = vrot.lane.b32.xlu0 %v5621_v2, %s4225_s8  ;;  %v2759_v39 = vld [vmem:[#allocation2 + $0x68] sm:$0xff] }
 0x1cb   : > { %3148 = vrot.lane.b32.xlu1 %v5544_v21, %s4227_s10  ;;  %v2197_v52 = vpop.permute.xlu0 %2196 }
 0x1cc   : > { %v2230_v12 = vadd.f32 %v2197_v52, %v2069_v58 }
 0x1cd   : > { %v5690_v35 = vpop.permute.xlu1 %2932  ;;  %3144 = vrot.lane.b32.xlu0 %v5423_v22, %s4227_s10 }
 0x1ce   : > { %2246 = vst.msk [vmem:[#allocation2 + $0x70] sm:$0xff] %vm1702_vm3, %v2230_v12 }
 0x1cf   : > { %3156 = vrot.lane.b32.xlu1 %v6117_v5, %s4227_s10  ;;  %v2799_v21 = vpop.permute.xlu0 %2798 }
 0x1d0   : > { %v2834_v10 = vadd.f32 %v2799_v21, %v2758_v61 }
 0x1d1   : > { %v2179_v28 = vpop.permute.xlu1 %2178  ;;  %3152 = vrot.lane.b32.xlu0 %v5599_v48, %s4227_s10  ;;  %v2749_v48 = vld [vmem:[#allocation2 + $0x18] sm:$0xff] }
 0x1d2   : > { %v2221_v56 = vadd.f32 %v2179_v28, %v2060_v37  ;;  %2850 = vst.msk [vmem:[#allocation2 + $0x60] sm:$0xff] %vm1702_vm3, %v2834_v10 }
 0x1d3   : > { %3164 = vrot.lane.b32.xlu1 %v5255_v30, %s4227_s10  ;;  %v2801_v29 = vpop.permute.xlu0 %2800  ;;  %v6118_v30 = vld [vmem:[#allocation12_spill] sm:$0xff] }
 0x1d4   : > { %2237 = vst.msk [vmem:[#allocation2 + $0x28] sm:$0xff] %vm1702_vm3, %v2221_v56  ;;  %v2835_v57 = vadd.f32 %v2801_v29, %v2759_v39 }
 0x1d5   : > { %v2779_v22 = vpop.permute.xlu1 %2778  ;;  %v2262_v14 = vld [vmem:[#allocation2 + $0x70] sm:$0xff]  ;;  %3160 = vrot.lane.b32.xlu0 %v6118_v30, %s4227_s10 }
 0x1d6   : > { %v2824_v45 = vadd.f32 %v2779_v22, %v2748_v27  ;;  %v2598_v59 = vadd.f32 %v5637_v60, %v2262_v14  ;;  %2851 = vst.msk [vmem:[#allocation2 + $0x68] sm:$0xff] %vm1702_vm3, %v2835_v57  ;;  %v6119_v27 = vld [vmem:[#allocation10_spill] sm:$0xff] }
 0x1d7   : > { %3172 = vrot.lane.b32.xlu1 %v5406_v41, %s4227_s10  ;;  %v3037_v17 = vpop.permute.xlu0 %3036 }
 0x1d8   : > { %2840 = vst.msk [vmem:[#allocation2 + $0x10] sm:$0xff] %vm1702_vm3, %v2824_v45  ;;  %2614 = vst.msk [vmem:[#allocation2 + $0x70] sm:$0xff] %vm1702_vm3, %v2598_v59  ;;  %v3083_v34 = vadd.f32 %v3037_v17, %v2985_v25  ;;  %v2061_v17 = vld [vmem:[#allocation2 + $0x30] sm:$0xff] }
 0x1d9   : > { %v2781_v50 = vpop.permute.xlu1 %2780  ;;  %3168 = vrot.lane.b32.xlu0 %v5518_v38, %s4227_s10  ;;  %v2866_v60 = vld [vmem:[#allocation2 + $0x60] sm:$0xff] }
 0x1da   : > { %v2825_v42 = vadd.f32 %v2781_v50, %v2749_v48  ;;  %3099 = vst.msk [vmem:[#allocation2 + $0x8] sm:$0xff] %vm1702_vm3, %v3083_v34  ;;  %v2964_v6 = vadd.f32 %v5646_v33, %v2866_v60  ;;  %v2059_v33 = vld [vmem:[#allocation2 + $0x20] sm:$0xff]  ;;  %v6121_v60 = vld [vmem:[#allocation11_spill] sm:$0xff] }
 0x1db   : > { %3276 = vrot.lane.b32.xlu1 %v5478_v24, %s4228_s11  ;;  %v2253_v41 = vld [vmem:[#allocation2 + $0x28] sm:$0xff]  ;;  %v3059_v52 = vpop.permute.xlu0 %3058 }
 0x1dc   : > { %2841 = vst.msk [vmem:[#allocation2 + $0x18] sm:$0xff] %vm1702_vm3, %v2825_v42  ;;  %v2589_v53 = vadd.f32 %v5663_v62, %v2253_v41  ;;  %2980 = vst.msk [vmem:[#allocation2 + $0x60] sm:$0xff] %vm1702_vm3, %v2964_v6  ;;  %v2631_v62 = vld [vmem:[#allocation2 + $0x78] sm:$0xff]  ;;  %v6122_v6 = vcombine.low %v5382_v44, %v5368_v49 }
 0x1dd   : > { %v3039_v58 = vpop.permute.xlu1 %3038  ;;  %3272 = vrot.lane.b32.xlu0 %v5209_v31, %s4228_s11  ;;  %v2867_v38 = vld [vmem:[#allocation2 + $0x68] sm:$0xff]  ;;  %v2062_v49 = vld [vmem:[#allocation2 + $0x38] sm:$0xff] }
 0x1de   : > { %2605 = vst.msk [vmem:[#allocation2 + $0x28] sm:$0xff] %vm1702_vm3, %v2589_v53  ;;  %v2965_v37 = vadd.f32 %v2931_v26, %v2867_v38 }
 0x1df   : > { %v2856_v24 = vld [vmem:[#allocation2 + $0x10] sm:$0xff]  ;;  %3284 = vrot.lane.b32.xlu1 %v5300_v19, %s4228_s11  ;;  %v2177_v28 = vpop.permute.xlu0 %2176 }
 0x1e0   : > { %v2954_v12 = vadd.f32 %v5635_v54, %v2856_v24  ;;  %v2630_v21 = vld [vmem:[#allocation2 + $0x70] sm:$0xff]  ;;  %v2220_v56 = vadd.f32 %v2177_v28, %v2059_v33  ;;  %2981 = vst.msk [vmem:[#allocation2 + $0x68] sm:$0xff] %vm1702_vm3, %v2965_v37 }
 0x1e1   : > { %v2697_v5 = vpop.permute.xlu1 %2696  ;;  %v2728_v54 = vadd.f32 %v5684_v8, %v2630_v21  ;;  %3280 = vrot.lane.b32.xlu0 %v5552_v51, %s4228_s11 }
 0x1e2   : > { %2970 = vst.msk [vmem:[#allocation2 + $0x10] sm:$0xff] %vm1702_vm3, %v2954_v12  ;;  %v2729_v61 = vadd.f32 %v2697_v5, %v2631_v62  ;;  %2236 = vst.msk [vmem:[#allocation2 + $0x20] sm:$0xff] %vm1702_vm3, %v2220_v56 }
 0x1e3   : > { %3292 = vrot.lane.b32.xlu1 %v5198_v11, %s4228_s11  ;;  %v2857_v19 = vld [vmem:[#allocation2 + $0x18] sm:$0xff]  ;;  %2744 = vst.msk [vmem:[#allocation2 + $0x70] sm:$0xff] %vm1702_vm3, %v2728_v54  ;;  %v2996_v10 = vld [vmem:[#allocation2 + $0x60] sm:$0xff]  ;;  %v2675_v11 = vpop.permute.xlu0 %2674 }
 0x1e4   : > { %2745 = vst.msk [vmem:[#allocation2 + $0x78] sm:$0xff] %vm1702_vm3, %v2729_v61  ;;  %v2955_v31 = vadd.f32 %v5676_v36, %v2857_v19  ;;  %v3094_v8 = vadd.f32 %v3059_v52, %v2996_v10 }
 0x1e5   : > { %v5736_v26 = vpop.permute.xlu1 %2934  ;;  %3288 = vrot.lane.b32.xlu0 %v6119_v27, %s4228_s11  ;;  %v2621_v36 = vld [vmem:[#allocation2 + $0x28] sm:$0xff] }
 0x1e6   : > { %2971 = vst.msk [vmem:[#allocation2 + $0x18] sm:$0xff] %vm1702_vm3, %v2955_v31  ;;  %3110 = vst.msk [vmem:[#allocation2 + $0x60] sm:$0xff] %vm1702_vm3, %v3094_v8 }
 0x1e7   : > { %3154 = vrot.lane.b32.xlu1 %v5621_v2, %s4227_s10  ;;  %v2549_v29 = vpop.permute.xlu0 %2548 }
 0x1e9   : > { %v2986_v51 = vld [vmem:[#allocation2 + $0x10] sm:$0xff]  ;;  %v2677_v22 = vpop.permute.xlu1 %2676  ;;  %v2252_v57 = vld [vmem:[#allocation2 + $0x20] sm:$0xff]  ;;  %3296 = vrot.lane.b32.xlu0 %v5409_v0, %s4228_s11 }
 0x1ea   : > { %v3084_v39 = vadd.f32 %v3039_v58, %v2986_v51  ;;  %v2719_v45 = vadd.f32 %v2677_v22, %v2621_v36  ;;  %v2588_v2 = vadd.f32 %v5654_v32, %v2252_v57  ;;  %v2760_v9 = vld [vmem:[#allocation2 + $0x70] sm:$0xff]  ;;  %v6120_v32 = vld [vmem:[#allocation7_spill] sm:$0xff] }
 0x1eb   : > { %3300 = vrot.lane.b32.xlu1 %v3254_v23, %s4228_s11  ;;  %v5754_v59 = vpop.permute.xlu0 %2912  ;;  %v2761_v50 = vld [vmem:[#allocation2 + $0x78] sm:$0xff] }
 0x1ec   : > { %3100 = vst.msk [vmem:[#allocation2 + $0x10] sm:$0xff] %vm1702_vm3, %v3084_v39  ;;  %2735 = vst.msk [vmem:[#allocation2 + $0x28] sm:$0xff] %vm1702_vm3, %v2719_v45  ;;  %v2063_v45 = vld [vmem:[#allocation2 + $0x40] sm:$0xff] }
 0x1ed   : > { %v2987_v14 = vld [vmem:[#allocation2 + $0x18] sm:$0xff]  ;;  %v3041_v30 = vpop.permute.xlu1 %3040  ;;  %2604 = vst.msk [vmem:[#allocation2 + $0x20] sm:$0xff] %vm1702_vm3, %v2588_v2  ;;  %3274 = vrot.lane.b32.xlu0 %v5341_v3, %s4228_s11 }
 0x1ee   : > { %v3085_v48 = vadd.f32 %v3041_v30, %v2987_v14 }
 0x1ef   : > { %3278 = vrot.lane.b32.xlu1 %v5501_v18, %s4228_s11  ;;  %v2915_v23 = vpop.permute.xlu0 %2914 }
 0x1f0   : > { %3101 = vst.msk [vmem:[#allocation2 + $0x18] sm:$0xff] %vm1702_vm3, %v3085_v48 }
 0x1f1   : > { %v2803_v13 = vpop.permute.xlu1 %2802  ;;  %3282 = vrot.lane.b32.xlu0 %v5275_v55, %s4228_s11 }
 0x1f2   : > { %v2836_v0 = vadd.f32 %v2803_v13, %v2760_v9  ;;  %v2064_v13 = vld [vmem:[#allocation2 + $0x48] sm:$0xff] }
 0x1f3   : > { %3286 = vrot.lane.b32.xlu1 %v6120_v32, %s4228_s11  ;;  %v2181_v42 = vpop.permute.xlu0 %2180  ;;  %v2751_v24 = vld [vmem:[#allocation2 + $0x28] sm:$0xff] }
 0x1f4   : > { %2852 = vst.msk [vmem:[#allocation2 + $0x70] sm:$0xff] %vm1702_vm3, %v2836_v0  ;;  %v2620_v18 = vld [vmem:[#allocation2 + $0x20] sm:$0xff]  ;;  %v2222_v3 = vadd.f32 %v2181_v42, %v2061_v17 }
 0x1f5   : > { %v2805_v25 = vpop.permute.xlu1 %2804  ;;  %v2718_v41 = vadd.f32 %v2675_v11, %v2620_v18  ;;  %3290 = vrot.lane.b32.xlu0 %v6121_v60, %s4228_s11 }
 0x1f6   : > { %v2837_v34 = vadd.f32 %v2805_v25, %v2761_v50  ;;  %2238 = vst.msk [vmem:[#allocation2 + $0x30] sm:$0xff] %vm1702_vm3, %v2222_v3 }
 0x1f7   : > { %3294 = vrot.lane.b32.xlu1 %v5216_v16, %s4228_s11  ;;  %2734 = vst.msk [vmem:[#allocation2 + $0x20] sm:$0xff] %vm1702_vm3, %v2718_v41  ;;  %v2783_v53 = vpop.permute.xlu0 %2782 }
 0x1f8   : > { %2853 = vst.msk [vmem:[#allocation2 + $0x78] sm:$0xff] %vm1702_vm3, %v2837_v34 }
 0x1f9   : > { %v2551_v55 = vpop.permute.xlu1 %2550  ;;  %3298 = vrot.lane.b32.xlu0 %v5177_v4, %s4228_s11 }
 0x1fb   : > { %3302 = vrot.lane.b32.xlu1 %v6122_v6, %s4228_s11  ;;  %v2868_v58 = vld [vmem:[#allocation2 + $0x70] sm:$0xff]  ;;  %v2785_v12 = vpop.permute.xlu0 %2784 }
 0x1fc   : > { %v2966_v16 = vadd.f32 %v5690_v35, %v2868_v58  ;;  %v2827_v38 = vadd.f32 %v2785_v12, %v2751_v24 }
 0x1fd   : > { %v3063_v52 = vpop.permute.xlu1 %3062  ;;  %v2254_v37 = vld [vmem:[#allocation2 + $0x30] sm:$0xff] }
 0x1fe   : > { %2982 = vst.msk [vmem:[#allocation2 + $0x70] sm:$0xff] %vm1702_vm3, %v2966_v16  ;;  %v2750_v5 = vld [vmem:[#allocation2 + $0x20] sm:$0xff]  ;;  %2843 = vst.msk [vmem:[#allocation2 + $0x28] sm:$0xff] %vm1702_vm3, %v2827_v38  ;;  %v2590_v61 = vadd.f32 %v2549_v29, %v2254_v37 }
 0x1ff   : > { %v2869_v62 = vld [vmem:[#allocation2 + $0x78] sm:$0xff]  ;;  %v2826_v28 = vadd.f32 %v2783_v53, %v2750_v5  ;;  %v2553_v4 = vpop.permute.xlu0 %2552 }
 0x200   : > { %v2967_v33 = vadd.f32 %v5736_v26, %v2869_v62  ;;  %2606 = vst.msk [vmem:[#allocation2 + $0x30] sm:$0xff] %vm1702_vm3, %v2590_v61 }
 0x201   : > { %v2183_v44 = vpop.permute.xlu1 %2182  ;;  %2842 = vst.msk [vmem:[#allocation2 + $0x20] sm:$0xff] %vm1702_vm3, %v2826_v28 }
 0x202   : > { %v2223_v21 = vadd.f32 %v2183_v44, %v2062_v49  ;;  %2983 = vst.msk [vmem:[#allocation2 + $0x78] sm:$0xff] %vm1702_vm3, %v2967_v33 }
 0x203   : > { %v2679_v54 = vpop.permute.xlu0 %2678 }
 0x204   : > { %2239 = vst.msk [vmem:[#allocation2 + $0x38] sm:$0xff] %vm1702_vm3, %v2223_v21 }
 0x205   : > { %v2998_v35 = vld [vmem:[#allocation2 + $0x70] sm:$0xff]  ;;  %v2917_v56 = vpop.permute.xlu1 %2916  ;;  %v2859_v31 = vld [vmem:[#allocation2 + $0x28] sm:$0xff] }
 0x206   : > { %v3096_v19 = vadd.f32 %v3063_v52, %v2998_v35  ;;  %v2957_v10 = vadd.f32 %v2915_v23, %v2859_v31 }
 0x207   : > { %v2622_v11 = vld [vmem:[#allocation2 + $0x30] sm:$0xff]  ;;  %v3043_v27 = vpop.permute.xlu0 %3042 }
 0x208   : > { %3112 = vst.msk [vmem:[#allocation2 + $0x70] sm:$0xff] %vm1702_vm3, %v3096_v19  ;;  %v2858_v8 = vld [vmem:[#allocation2 + $0x20] sm:$0xff]  ;;  %v2720_v51 = vadd.f32 %v2679_v54, %v2622_v11  ;;  %2973 = vst.msk [vmem:[#allocation2 + $0x28] sm:$0xff] %vm1702_vm3, %v2957_v10  ;;  %v2995_v19 = vld [vmem:[#allocation2 + $0x58] sm:$0xff] }
 0x209   : > { %v2555_v26 = vpop.permute.xlu1 %2554  ;;  %v2956_v36 = vadd.f32 %v5754_v59, %v2858_v8  ;;  %v2997_v10 = vld [vmem:[#allocation2 + $0x68] sm:$0xff] }
 0x20a   : > { %2736 = vst.msk [vmem:[#allocation2 + $0x30] sm:$0xff] %vm1702_vm3, %v2720_v51  ;;  %v2999_v51 = vld [vmem:[#allocation2 + $0x78] sm:$0xff] }
 0x20b   : > { %v2255_v22 = vld [vmem:[#allocation2 + $0x38] sm:$0xff]  ;;  %2972 = vst.msk [vmem:[#allocation2 + $0x20] sm:$0xff] %vm1702_vm3, %v2956_v36  ;;  %v2185_v57 = vpop.permute.xlu0 %2184 }
 0x20c   : > { %v2591_v39 = vadd.f32 %v2551_v55, %v2255_v22  ;;  %v2224_v2 = vadd.f32 %v2185_v57, %v2063_v45  ;;  %v2065_v55 = vld [vmem:[#allocation2 + $0x50] sm:$0xff] }
 0x20d   : > { %v2681_v29 = vpop.permute.xlu1 %2680  ;;  %v3116_v57 = vld [vmem:[#allocation2 + $0x10] sm:$0xff] }
 0x20e   : > { %2607 = vst.msk [vmem:[#allocation2 + $0x38] sm:$0xff] %vm1702_vm3, %v2591_v39  ;;  %2240 = vst.msk [vmem:[#allocation2 + $0x40] sm:$0xff] %vm1702_vm3, %v2224_v2 }
 0x20f   : > { %v2557_v30 = vpop.permute.xlu0 %2556  ;;  %v2989_v38 = vld [vmem:[#allocation2 + $0x28] sm:$0xff] }
 0x211   : > { %v2919_v14 = vpop.permute.xlu1 %2918  ;;  %v2752_v17 = vld [vmem:[#allocation2 + $0x30] sm:$0xff] }
 0x212   : > { %v2988_v48 = vld [vmem:[#allocation2 + $0x20] sm:$0xff] }
 0x213   : > { %v3086_v59 = vadd.f32 %v3043_v27, %v2988_v48  ;;  %v2683_v32 = vpop.permute.xlu0 %2682 }
 0x215   : > { %v2623_v9 = vld [vmem:[#allocation2 + $0x38] sm:$0xff]  ;;  %v2187_v23 = vpop.permute.xlu1 %2186  ;;  %3102 = vst.msk [vmem:[#allocation2 + $0x20] sm:$0xff] %vm1702_vm3, %v3086_v59  ;;  %v2256_v25 = vld [vmem:[#allocation2 + $0x40] sm:$0xff] }
 0x216   : > { %v2721_v0 = vadd.f32 %v2681_v29, %v2623_v9  ;;  %v2225_v50 = vadd.f32 %v2187_v23, %v2064_v13  ;;  %v2592_v18 = vadd.f32 %v2553_v4, %v2256_v25 }
 0x217   : > { %v5798_v34 = vpop.permute.xlu0 %2920 }
 0x218   : > { %2737 = vst.msk [vmem:[#allocation2 + $0x38] sm:$0xff] %vm1702_vm3, %v2721_v0  ;;  %2241 = vst.msk [vmem:[#allocation2 + $0x48] sm:$0xff] %vm1702_vm3, %v2225_v50 }
 0x219   : > { %v2787_v42 = vpop.permute.xlu1 %2786  ;;  %2608 = vst.msk [vmem:[#allocation2 + $0x40] sm:$0xff] %vm1702_vm3, %v2592_v18 }
 0x21a   : > { %v2828_v41 = vadd.f32 %v2787_v42, %v2752_v17  ;;  %v3126_v42 = vld [vmem:[#allocation2 + $0x60] sm:$0xff] }
 0x21b   : > { %v2189_v60 = vpop.permute.xlu0 %2188 }
 0x21c   : > { %2844 = vst.msk [vmem:[#allocation2 + $0x30] sm:$0xff] %vm1702_vm3, %v2828_v41  ;;  %v2226_v6 = vadd.f32 %v2189_v60, %v2065_v55 }
 0x21d   : > { %v2789_v3 = vpop.permute.xlu1 %2788 }
 0x21e   : > { %2242 = vst.msk [vmem:[#allocation2 + $0x50] sm:$0xff] %vm1702_vm3, %v2226_v6  ;;  %v3117_v6 = vld [vmem:[#allocation2 + $0x18] sm:$0xff] }
 0x21f   : > { %v2257_v53 = vld [vmem:[#allocation2 + $0x48] sm:$0xff]  ;;  %v2753_v58 = vld [vmem:[#allocation2 + $0x38] sm:$0xff]  ;;  %v3045_v62 = vpop.permute.xlu0 %3044 }
 0x220   : > { %v2593_v16 = vadd.f32 %v2555_v26, %v2257_v53  ;;  %v2829_v52 = vadd.f32 %v2789_v3, %v2753_v58  ;;  %v2624_v12 = vld [vmem:[#allocation2 + $0x40] sm:$0xff]  ;;  %v3087_v37 = vadd.f32 %v3045_v62, %v2989_v38 }
 0x221   : > { %v3047_v24 = vpop.permute.xlu1 %3046  ;;  %v2722_v5 = vadd.f32 %v2683_v32, %v2624_v12 }
 0x222   : > { %2609 = vst.msk [vmem:[#allocation2 + $0x48] sm:$0xff] %vm1702_vm3, %v2593_v16  ;;  %2845 = vst.msk [vmem:[#allocation2 + $0x38] sm:$0xff] %vm1702_vm3, %v2829_v52 }
 0x223   : > { %v2860_v33 = vld [vmem:[#allocation2 + $0x30] sm:$0xff]  ;;  %2738 = vst.msk [vmem:[#allocation2 + $0x40] sm:$0xff] %vm1702_vm3, %v2722_v5  ;;  %3103 = vst.msk [vmem:[#allocation2 + $0x28] sm:$0xff] %vm1702_vm3, %v3087_v37  ;;  %v5808_v44 = vpop.permute.xlu0 %3052  ;;  %v3115_v5 = vld [vmem:[#allocation2 + $0x8] sm:$0xff] }
 0x224   : > { %v2958_v28 = vadd.f32 %v2917_v56, %v2860_v33 }
 0x225   : > { %v3049_v49 = vpop.permute.xlu1 %3048  ;;  %v2258_v61 = vld [vmem:[#allocation2 + $0x50] sm:$0xff] }
 0x226   : > { %2974 = vst.msk [vmem:[#allocation2 + $0x30] sm:$0xff] %vm1702_vm3, %v2958_v28  ;;  %v2594_v21 = vadd.f32 %v2557_v30, %v2258_v61  ;;  %v3118_v30 = vld [vmem:[#allocation2 + $0x20] sm:$0xff] }
 0x227   : > { %v3061_v56 = vpop.permute.xlu0 %3060 }
 0x228   : > { %2610 = vst.msk [vmem:[#allocation2 + $0x50] sm:$0xff] %vm1702_vm3, %v2594_v21  ;;  %v3095_v8 = vadd.f32 %v3061_v56, %v2997_v10 }
 0x229   : > { %v2625_v4 = vld [vmem:[#allocation2 + $0x48] sm:$0xff]  ;;  %v2861_v35 = vld [vmem:[#allocation2 + $0x38] sm:$0xff]  ;;  %v3057_v54 = vpop.permute.xlu1 %3056 }
 0x22a   : > { %v2723_v31 = vadd.f32 %v5463_v63, %v2625_v4  ;;  %v2959_v26 = vadd.f32 %v2919_v14, %v2861_v35  ;;  %v3093_v11 = vadd.f32 %v3057_v54, %v2995_v19  ;;  %3111 = vst.msk [vmem:[#allocation2 + $0x68] sm:$0xff] %vm1702_vm3, %v3095_v8  ;;  %v3114_v63 = vld [vmem:[#allocation2] sm:$0xff]  ;;  %v3119_v4 = vld [vmem:[#allocation2 + $0x28] sm:$0xff] }
 0x22b   : > { %v3143_v39 = vpop.permute.xlu0 %3142  ;;  %v2754_v52 = vld [vmem:[#allocation2 + $0x40] sm:$0xff] }
 0x22c   : > { %2739 = vst.msk [vmem:[#allocation2 + $0x48] sm:$0xff] %vm1702_vm3, %v2723_v31  ;;  %2975 = vst.msk [vmem:[#allocation2 + $0x38] sm:$0xff] %vm1702_vm3, %v2959_v26  ;;  %v3190_v45 = vadd.f32 %v3143_v39, %v3114_v63 }
 0x22d   : > { %3109 = vst.msk [vmem:[#allocation2 + $0x58] sm:$0xff] %vm1702_vm3, %v3093_v11  ;;  %v2990_v27 = vld [vmem:[#allocation2 + $0x30] sm:$0xff]  ;;  %v3065_v36 = vpop.permute.xlu1 %3064 }
 0x22e   : > { %v3088_v22 = vadd.f32 %v3047_v24, %v2990_v27  ;;  %v3097_v29 = vadd.f32 %v3065_v36, %v2999_v51  ;;  %3206 = vst.msk [vmem:[#allocation2] sm:$0xff] %vm1702_vm3, %v3190_v45 }
 0x22f   : > { %v2626_v14 = vld [vmem:[#allocation2 + $0x50] sm:$0xff]  ;;  %v3151_v48 = vpop.permute.xlu0 %3150 }
 0x230   : > { %3104 = vst.msk [vmem:[#allocation2 + $0x30] sm:$0xff] %vm1702_vm3, %v3088_v22  ;;  %3113 = vst.msk [vmem:[#allocation2 + $0x78] sm:$0xff] %vm1702_vm3, %v3097_v29  ;;  %v2724_v9 = vadd.f32 %v5497_v15, %v2626_v14  ;;  %v3194_v0 = vadd.f32 %v3151_v48, %v3118_v30  ;;  %v3128_v15 = vld [vmem:[#allocation2 + $0x70] sm:$0xff] }
 0x231   : > { %v3147_v2 = vpop.permute.xlu1 %3146  ;;  %v3127_v36 = vld [vmem:[#allocation2 + $0x68] sm:$0xff] }
 0x232   : > { %v3192_v59 = vadd.f32 %v3147_v2, %v3116_v57  ;;  %2740 = vst.msk [vmem:[#allocation2 + $0x50] sm:$0xff] %vm1702_vm3, %v2724_v9  ;;  %3210 = vst.msk [vmem:[#allocation2 + $0x20] sm:$0xff] %vm1702_vm3, %v3194_v0 }
 0x233   : > { %v2755_v13 = vld [vmem:[#allocation2 + $0x48] sm:$0xff]  ;;  %v2991_v23 = vld [vmem:[#allocation2 + $0x38] sm:$0xff]  ;;  %v5828_v18 = vpop.permute.xlu0 %3158 }
 0x234   : > { %v2831_v32 = vadd.f32 %v5489_v47, %v2755_v13  ;;  %v3089_v50 = vadd.f32 %v3049_v49, %v2991_v23  ;;  %3208 = vst.msk [vmem:[#allocation2 + $0x10] sm:$0xff] %vm1702_vm3, %v3192_v59 }
 0x235   : > { %v5824_v25 = vpop.permute.xlu1 %3162  ;;  %v3222_v14 = vld [vmem:[#allocation2] sm:$0xff] }
 0x236   : > { %2847 = vst.msk [vmem:[#allocation2 + $0x48] sm:$0xff] %vm1702_vm3, %v2831_v32  ;;  %3105 = vst.msk [vmem:[#allocation2 + $0x38] sm:$0xff] %vm1702_vm3, %v3089_v50 }
 0x237   : > { %v3167_v41 = vpop.permute.xlu0 %3166  ;;  %v3129_v11 = vld [vmem:[#allocation2 + $0x78] sm:$0xff]  ;;  %v3120_v32 = vld [vmem:[#allocation2 + $0x30] sm:$0xff] }
 0x238   : > { %v3202_v3 = vadd.f32 %v3167_v41, %v3126_v42 }
 0x239   : > { %v3171_v17 = vpop.permute.xlu1 %3170  ;;  %v2756_v60 = vld [vmem:[#allocation2 + $0x50] sm:$0xff] }
 0x23a   : > { %v3204_v47 = vadd.f32 %v3171_v17, %v3128_v15  ;;  %v2832_v53 = vadd.f32 %v5576_v43, %v2756_v60  ;;  %3218 = vst.msk [vmem:[#allocation2 + $0x60] sm:$0xff] %vm1702_vm3, %v3202_v3 }
 0x23b   : > { %v2791_v24 = vpop.permute.xlu0 %2790 }
 0x23c   : > { %3220 = vst.msk [vmem:[#allocation2 + $0x70] sm:$0xff] %vm1702_vm3, %v3204_v47  ;;  %2848 = vst.msk [vmem:[#allocation2 + $0x50] sm:$0xff] %vm1702_vm3, %v2832_v53  ;;  %v2830_v38 = vadd.f32 %v2791_v24, %v2754_v52 }
 0x23d   : > { %v2863_v55 = vld [vmem:[#allocation2 + $0x48] sm:$0xff]  ;;  %v3149_v58 = vpop.permute.xlu1 %3148  ;;  %v3121_v62 = vld [vmem:[#allocation2 + $0x38] sm:$0xff] }
 0x23e   : > { %v2961_v16 = vadd.f32 %v5473_v1, %v2863_v55  ;;  %v3193_v12 = vadd.f32 %v3149_v58, %v3117_v6  ;;  %2846 = vst.msk [vmem:[#allocation2 + $0x40] sm:$0xff] %vm1702_vm3, %v2830_v38  ;;  %v3125_v1 = vld [vmem:[#allocation2 + $0x58] sm:$0xff] }
 0x23f   : > { %v3145_v37 = vpop.permute.xlu0 %3144 }
 0x240   : > { %2977 = vst.msk [vmem:[#allocation2 + $0x48] sm:$0xff] %vm1702_vm3, %v2961_v16  ;;  %3209 = vst.msk [vmem:[#allocation2 + $0x18] sm:$0xff] %vm1702_vm3, %v3193_v12  ;;  %v3191_v28 = vadd.f32 %v3145_v37, %v3115_v5 }
 0x241   : > { %v3157_v43 = vpop.permute.xlu1 %3156  ;;  %v3234_v55 = vld [vmem:[#allocation2 + $0x60] sm:$0xff] }
 0x242   : > { %v3197_v33 = vadd.f32 %v3157_v43, %v3121_v62  ;;  %3207 = vst.msk [vmem:[#allocation2 + $0x8] sm:$0xff] %vm1702_vm3, %v3191_v28 }
 0x243   : > { %v2864_v61 = vld [vmem:[#allocation2 + $0x50] sm:$0xff]  ;;  %v3153_v21 = vpop.permute.xlu0 %3152 }
 0x244   : > { %3213 = vst.msk [vmem:[#allocation2 + $0x38] sm:$0xff] %vm1702_vm3, %v3197_v33  ;;  %v2962_v54 = vadd.f32 %v5514_v20, %v2864_v61  ;;  %v3195_v31 = vadd.f32 %v3153_v21, %v3119_v4  ;;  %v3224_v20 = vld [vmem:[#allocation2 + $0x10] sm:$0xff] }
 0x245   : > { %v3165_v49 = vpop.permute.xlu1 %3164  ;;  %v2862_v10 = vld [vmem:[#allocation2 + $0x40] sm:$0xff]  ;;  %v3236_v3 = vld [vmem:[#allocation2 + $0x70] sm:$0xff] }
 0x246   : > { %v3201_v35 = vadd.f32 %v3165_v49, %v3125_v1  ;;  %2978 = vst.msk [vmem:[#allocation2 + $0x50] sm:$0xff] %vm1702_vm3, %v2962_v54  ;;  %v2960_v56 = vadd.f32 %v5798_v34, %v2862_v10  ;;  %3211 = vst.msk [vmem:[#allocation2 + $0x28] sm:$0xff] %vm1702_vm3, %v3195_v31 }
 0x247   : > { %v2993_v19 = vld [vmem:[#allocation2 + $0x48] sm:$0xff]  ;;  %v3161_v27 = vpop.permute.xlu0 %3160 }
 0x248   : > { %v3091_v26 = vadd.f32 %v5808_v44, %v2993_v19  ;;  %3217 = vst.msk [vmem:[#allocation2 + $0x58] sm:$0xff] %vm1702_vm3, %v3201_v35  ;;  %2976 = vst.msk [vmem:[#allocation2 + $0x40] sm:$0xff] %vm1702_vm3, %v2960_v56  ;;  %v5875_v56 = vld [vmem:[%s6044_s2] ss:$0 sm:$0xff] }
 0x249   : > { %v3173_v8 = vpop.permute.xlu1 %3172  ;;  %v3223_v52 = vld [vmem:[#allocation2 + $0x8] sm:$0xff] }
 0x24a   : > { %3107 = vst.msk [vmem:[#allocation2 + $0x48] sm:$0xff] %vm1702_vm3, %v3091_v26  ;;  %v3205_v51 = vadd.f32 %v3173_v8, %v3129_v11 }
 0x24b   : > { %v3169_v22 = vpop.permute.xlu0 %3168  ;;  %v3229_v37 = vld [vmem:[#allocation2 + $0x38] sm:$0xff] }
 0x24c   : > { %3221 = vst.msk [vmem:[#allocation2 + $0x78] sm:$0xff] %vm1702_vm3, %v3205_v51  ;;  %v3203_v39 = vadd.f32 %v3169_v22, %v3127_v36 }
 0x24d   : > { %v3277_v44 = vpop.permute.xlu1 %3276  ;;  %v2994_v29 = vld [vmem:[#allocation2 + $0x50] sm:$0xff]  ;;  %v3227_v1 = vld [vmem:[#allocation2 + $0x28] sm:$0xff] }
 0x24e   : > { %v3322_v63 = vadd.f32 %v3277_v44, %v3224_v20  ;;  %v3092_v34 = vadd.f32 %v5607_v46, %v2994_v29  ;;  %3219 = vst.msk [vmem:[#allocation2 + $0x68] sm:$0xff] %vm1702_vm3, %v3203_v39  ;;  %v3226_v46 = vld [vmem:[#allocation2 + $0x20] sm:$0xff] }
 0x24f   : > { %v3273_v30 = vpop.permute.xlu0 %3272  ;;  %v2992_v48 = vld [vmem:[#allocation2 + $0x40] sm:$0xff]  ;;  %v3233_v35 = vld [vmem:[#allocation2 + $0x58] sm:$0xff] }
 0x250   : > { %3338 = vst.msk [vmem:[#allocation2 + $0x10] sm:$0xff] %vm1702_vm3, %v3322_v63  ;;  %3108 = vst.msk [vmem:[#allocation2 + $0x50] sm:$0xff] %vm1702_vm3, %v3092_v34  ;;  %v3320_v59 = vadd.f32 %v3273_v30, %v3222_v14  ;;  %v3090_v9 = vadd.f32 %v5532_v40, %v2992_v48 }
 0x251   : > { %v3123_v45 = vld [vmem:[#allocation2 + $0x48] sm:$0xff]  ;;  %v3285_v57 = vpop.permute.xlu1 %3284 }
 0x252   : > { %v3199_v2 = vadd.f32 %v3161_v27, %v3123_v45  ;;  %3336 = vst.msk [vmem:[#allocation2] sm:$0xff] %vm1702_vm3, %v3320_v59  ;;  %3106 = vst.msk [vmem:[#allocation2 + $0x40] sm:$0xff] %vm1702_vm3, %v3090_v9  ;;  %v3910_v59 = vld [vmem:[%s6045_s3] ss:$0 sm:$0xff] }
 0x253   : > { %v3281_v23 = vpop.permute.xlu0 %3280  ;;  %v3237_v27 = vld [vmem:[#allocation2 + $0x78] sm:$0xff] }
 0x254   : > { %3215 = vst.msk [vmem:[#allocation2 + $0x48] sm:$0xff] %vm1702_vm3, %v3199_v2  ;;  %v3324_v0 = vadd.f32 %v3281_v23, %v3226_v46 }
 0x255   : > { %v3293_v13 = vpop.permute.xlu1 %3292  ;;  %v3235_v63 = vld [vmem:[#allocation2 + $0x68] sm:$0xff] }
 0x256   : > { %3340 = vst.msk [vmem:[#allocation2 + $0x20] sm:$0xff] %vm1702_vm3, %v3324_v0 }
 0x257   : > { %v3124_v15 = vld [vmem:[#allocation2 + $0x50] sm:$0xff]  ;;  %v3289_v17 = vpop.permute.xlu0 %3288 }
 0x258   : > { %v3200_v41 = vadd.f32 %v5824_v25, %v3124_v15  ;;  %v3225_v25 = vld [vmem:[#allocation2 + $0x18] sm:$0xff]  ;;  %v3354_v11 = vld [vmem:[#allocation2 + $0x10] sm:$0xff] }
 0x259   : > { %v3155_v50 = vpop.permute.xlu1 %3154  ;;  %v3122_v40 = vld [vmem:[#allocation2 + $0x40] sm:$0xff] }
 0x25a   : > { %v3196_v42 = vadd.f32 %v3155_v50, %v3120_v32  ;;  %3216 = vst.msk [vmem:[#allocation2 + $0x50] sm:$0xff] %vm1702_vm3, %v3200_v41  ;;  %v3198_v47 = vadd.f32 %v5828_v18, %v3122_v40  ;;  %v3352_v44 = vld [vmem:[#allocation2] sm:$0xff] }
 0x25b   : > { %v3297_v53 = vpop.permute.xlu0 %3296  ;;  %v3231_v54 = vld [vmem:[#allocation2 + $0x48] sm:$0xff]  ;;  %v3375_v50 = vmul.f32 %v5875_v56, %v3352_v44 }
 0x25c   : > { %3212 = vst.msk [vmem:[#allocation2 + $0x30] sm:$0xff] %vm1702_vm3, %v3196_v42  ;;  %3214 = vst.msk [vmem:[#allocation2 + $0x40] sm:$0xff] %vm1702_vm3, %v3198_v47  ;;  %v3332_v58 = vadd.f32 %v3297_v53, %v3234_v55 }
 0x25d   : > { %v3301_v60 = vpop.permute.xlu1 %3300  ;;  %v3356_v8 = vld [vmem:[#allocation2 + $0x20] sm:$0xff] }
 0x25e   : > { %v3334_v6 = vadd.f32 %v3301_v60, %v3236_v3  ;;  %3348 = vst.msk [vmem:[#allocation2 + $0x60] sm:$0xff] %vm1702_vm3, %v3332_v58  ;;  %v3379_v2 = vmul.f32 %v5875_v56, %v3356_v8 }
 0x25f   : > { %v3275_v24 = vpop.permute.xlu0 %3274 }
 0x260   : > { %3350 = vst.msk [vmem:[#allocation2 + $0x70] sm:$0xff] %vm1702_vm3, %v3334_v6  ;;  %v3321_v62 = vadd.f32 %v3275_v24, %v3223_v52  ;;  %v5897_v3 = vadd.f32 %v3910_v59, %v3379_v2  ;;  %v4229_v52 = vmov 1934713408  }
 0x261   : > { %v3279_v16 = vpop.permute.xlu1 %3278  ;;  %v3232_v18 = vld [vmem:[#allocation2 + $0x50] sm:$0xff]  ;;  %v3481_v24 = vunpack.c.l.s4 %v4229_v52 }
 0x262   : > { %v3323_v12 = vadd.f32 %v3279_v16, %v3225_v25  ;;  %v3330_v5 = vadd.f32 %v3293_v13, %v3232_v18  ;;  %3337 = vst.msk [vmem:[#allocation2 + $0x8] sm:$0xff] %vm1702_vm3, %v3321_v62 }
 0x263   : > { %v3228_v38 = vld [vmem:[#allocation2 + $0x30] sm:$0xff]  ;;  %v3230_v28 = vld [vmem:[#allocation2 + $0x40] sm:$0xff]  ;;  %v3283_v49 = vpop.permute.xlu0 %3282 }
 0x264   : > { %v3326_v43 = vadd.f32 %v3285_v57, %v3228_v38  ;;  %3339 = vst.msk [vmem:[#allocation2 + $0x18] sm:$0xff] %vm1702_vm3, %v3323_v12  ;;  %3346 = vst.msk [vmem:[#allocation2 + $0x50] sm:$0xff] %vm1702_vm3, %v3330_v5  ;;  %v3328_v4 = vadd.f32 %v3289_v17, %v3230_v28  ;;  %v3325_v21 = vadd.f32 %v3283_v49, %v3227_v1 }
 0x265   : > { %v3287_v33 = vpop.permute.xlu1 %3286  ;;  %v3364_v51 = vld [vmem:[#allocation2 + $0x60] sm:$0xff]  ;;  %v3377_v57 = vmul.f32 %v5875_v56, %v3354_v11  ;;  %v3398_v12 = vadd.f32 %v3910_v59, %v3375_v50 }
 0x266   : > { %3342 = vst.msk [vmem:[#allocation2 + $0x30] sm:$0xff] %vm1702_vm3, %v3326_v43  ;;  %v3327_v61 = vadd.f32 %v3287_v33, %v3229_v37  ;;  %3344 = vst.msk [vmem:[#allocation2 + $0x40] sm:$0xff] %vm1702_vm3, %v3328_v4  ;;  %v3387_v13 = vmul.f32 %v5875_v56, %v3364_v51 }
 0x267   : > { %3341 = vst.msk [vmem:[#allocation2 + $0x28] sm:$0xff] %vm1702_vm3, %v3325_v21  ;;  %v3291_v31 = vpop.permute.xlu0 %3290  ;;  %v3366_v22 = vld [vmem:[#allocation2 + $0x70] sm:$0xff]  ;;  %v3400_v47 = vadd.f32 %v3910_v59, %v3377_v57  ;;  %v3414_v33 = vcombine.low %v3398_v12, %v5897_v3 }
 0x268   : > { %3343 = vst.msk [vmem:[#allocation2 + $0x38] sm:$0xff] %vm1702_vm3, %v3327_v61  ;;  %v3329_v10 = vadd.f32 %v3291_v31, %v3231_v54  ;;  %v3389_v15 = vmul.f32 %v5875_v56, %v3366_v22  ;;  %v3410_v25 = vadd.f32 %v3910_v59, %v3387_v13  ;;  %v6123_v22 = vld [vmem:[#allocation6_spill] sm:$0xff] }
 0x269   : > { %v3295_v19 = vpop.permute.xlu1 %3294  ;;  %v3353_v46 = vld [vmem:[#allocation2 + $0x8] sm:$0xff] }
 0x26a   : > { %v3331_v26 = vadd.f32 %v3295_v19, %v3233_v35  ;;  %3345 = vst.msk [vmem:[#allocation2 + $0x48] sm:$0xff] %vm1702_vm3, %v3329_v10  ;;  %v3376_v53 = vmul.f32 %v5875_v56, %v3353_v46  ;;  %v3412_v38 = vadd.f32 %v3910_v59, %v3389_v15  ;;  %v3482_v19 = vunpack.c.0.s8 %v3481_v24 }
 0x26b   : > { %v3299_v39 = vpop.permute.xlu0 %3298  ;;  %v3355_v34 = vld [vmem:[#allocation2 + $0x18] sm:$0xff]  ;;  %v3362_v45 = vld [vmem:[#allocation2 + $0x50] sm:$0xff] }
 0x26c   : > { %3347 = vst.msk [vmem:[#allocation2 + $0x58] sm:$0xff] %vm1702_vm3, %v3331_v26  ;;  %v3333_v30 = vadd.f32 %v3299_v39, %v3235_v63  ;;  %v3385_v9 = vmul.f32 %v5875_v56, %v3362_v45  ;;  %v3378_v42 = vmul.f32 %v5875_v56, %v3355_v34  ;;  %v5913_v61 = vadd.f32 %v3910_v59, %v3376_v53 }
 0x26d   : > { %v3303_v20 = vpop.permute.xlu1 %3302  ;;  %v3358_v36 = vld [vmem:[#allocation2 + $0x30] sm:$0xff]  ;;  %v3360_v32 = vld [vmem:[#allocation2 + $0x40] sm:$0xff]  ;;  %v5927_v63 = vsub.s32 %v3482_v19, %v6123_v22 }
 0x26e   : > { %v3335_v29 = vadd.f32 %v3303_v20, %v3237_v27  ;;  %v3381_v14 = vmul.f32 %v5875_v56, %v3358_v36  ;;  %v3357_v23 = vld [vmem:[#allocation2 + $0x28] sm:$0xff]  ;;  %3349 = vst.msk [vmem:[#allocation2 + $0x68] sm:$0xff] %vm1702_vm3, %v3333_v30  ;;  %v3383_v40 = vmul.f32 %v5875_v56, %v3360_v32  ;;  %v5899_v60 = vadd.f32 %v3910_v59, %v3385_v9 }
 0x26f   : > { %v3359_v48 = vld [vmem:[#allocation2 + $0x38] sm:$0xff]  ;;  %v3380_v41 = vmul.f32 %v5875_v56, %v3357_v23  ;;  %v5905_v18 = vadd.f32 %v3910_v59, %v3378_v42  ;;  %v3422_v27 = vrot.slane %v3414_v33, %v4352_v7  ;;  %v3415_v23 = vcombine.high %v3398_v12, %v5897_v3 }
 0x270   : > { %3351 = vst.msk [vmem:[#allocation2 + $0x78] sm:$0xff] %vm1702_vm3, %v3335_v29  ;;  %v3382_v0 = vmul.f32 %v5875_v56, %v3359_v48  ;;  %v5891_v17 = vadd.f32 %v3910_v59, %v3381_v14  ;;  %v3406_v58 = vadd.f32 %v3910_v59, %v3383_v40  ;;  %v3462_v28 = vcombine.low %v5899_v60, %v3412_v38 }
 0x271   : > { %v3361_v16 = vld [vmem:[#allocation2 + $0x48] sm:$0xff]  ;;  %v5907_v43 = vadd.f32 %v3910_v59, %v3380_v41  ;;  %v3463_v15 = vcombine.high %v5899_v60, %v3412_v38 }
 0x272   : > { %v5902_v6 = vadd.f32 %v3910_v59, %v3382_v0  ;;  %v3430_v62 = vcombine.low %v3400_v47, %v5891_v17  ;;  %v3446_v5 = vcombine.low %v3406_v58, %v3410_v25  ;;  %v3384_v49 = vmul.f32 %v5875_v56, %v3361_v16 }
 0x273   : > { %v3363_v55 = vld [vmem:[#allocation2 + $0x58] sm:$0xff]  ;;  %v3550_v10 = vcombine.low %v5913_v61, %v5907_v43  ;;  %v3470_v51 = vrot.slane %v3462_v28, %v4352_v7  ;;  %v3447_v46 = vcombine.high %v3406_v58, %v3410_v25  ;;  %v3429_v58 = vrot.slane %v3415_v23, %v4352_v7 }
 0x274   : > { %v3386_v37 = vmul.f32 %v5875_v56, %v3363_v55  ;;  %v3566_v4 = vcombine.low %v5905_v18, %v5902_v6  ;;  %v3438_v54 = vrot.slane %v3430_v62, %v4352_v7  ;;  %v3454_v31 = vrot.slane %v3446_v5, %v4352_v7 }
 0x275   : > { %v3365_v21 = vld [vmem:[#allocation2 + $0x68] sm:$0xff]  ;;  %v3407_v20 = vadd.f32 %v3910_v59, %v3384_v49  ;;  %v3461_v3 = vrot.slane %v3447_v46, %v4352_v7  ;;  %v3477_v25 = vrot.slane %v3463_v15, %v4352_v7  ;;  %v3551_v19 = vcombine.high %v5913_v61, %v5907_v43 }
 0x276   : > { %v3388_v26 = vmul.f32 %v5875_v56, %v3365_v21  ;;  %v3409_v11 = vadd.f32 %v3910_v59, %v3386_v37  ;;  %v3574_v36 = vrot.slane %v3566_v4, %v4352_v7  ;;  %v3478_v29 = vcombine.low %v3422_v27, %v3438_v54 }
 0x277   : > { %v3367_v1 = vld [vmem:[#allocation2 + $0x78] sm:$0xff]  ;;  %v3510_v34 = vcombine.low %v3454_v31, %v3470_v51  ;;  %v3479_v42 = vcombine.high %v3422_v27, %v3438_v54  ;;  %v3511_v41 = vcombine.high %v3454_v31, %v3470_v51  ;;  %v3526_v62 = vcombine.low %v3461_v3, %v3477_v25 }
 0x278   : > { %v3390_v35 = vmul.f32 %v5875_v56, %v3367_v1  ;;  %v3411_v44 = vadd.f32 %v3910_v59, %v3388_v26  ;;  %v3558_v56 = vrot.slane %v3550_v10, %v4352_v7  ;;  %v5933_v30 = vrot.slane %v3478_v29, %v5927_v63 }
 0x279   : > { %v5936_v48 = vrot.slane %v3510_v34, %v5927_v63  ;;  %v3493_v16 = vrot.slane %v3479_v42, %v5927_v63  ;;  %v3525_v52 = vrot.slane %v3511_v41, %v5927_v63  ;;  %v3567_v37 = vcombine.high %v5905_v18, %v5902_v6 }
 0x27a   : > { %v3413_v8 = vadd.f32 %v3910_v59, %v3390_v35  ;;  %v3582_v45 = vcombine.low %v3407_v20, %v3411_v44  ;;  %v3614_v14 = vcombine.low %v3558_v56, %v3574_v36  ;;  %v3431_v59 = vcombine.high %v3400_v47, %v5891_v17 }
 0x27b   : > { %v3615_v50 = vcombine.high %v3558_v56, %v3574_v36  ;;  %v3542_v55 = vcombine.low %v5933_v30, %v5936_v48  ;;  %v3583_v33 = vcombine.high %v3407_v20, %v3411_v44  ;;  %v3544_v28 = vcombine.low %v3493_v16, %v3525_v52 }
 0x27c   : > { %v3598_v39 = vcombine.low %v3409_v11, %v3413_v8  ;;  %v3590_v2 = vrot.slane %v3582_v45, %v4352_v7  ;;  %v3622_v0 = vrot.slane %v3614_v14, %v5927_v63  ;;  %v3445_v40 = vrot.slane %v3431_v59, %v4352_v7 }
 0x27d   : > { %v3629_v60 = vrot.slane %v3615_v50, %v5927_v63  ;;  %v3599_v5 = vcombine.high %v3409_v11, %v3413_v8  ;;  %v3543_v1 = vcombine.high %v5933_v30, %v5936_v48  ;;  %v3534_v21 = vrot.slane %v3526_v62, %v5927_v63 }
 0x27e   : > { %v3606_v57 = vrot.slane %v3598_v39, %v4352_v7  ;;  %v3494_v24 = vcombine.low %v3429_v58, %v3445_v40  ;;  %v3495_v4 = vcombine.high %v3429_v58, %v3445_v40  ;;  %v3527_v35 = vcombine.high %v3461_v3, %v3477_v25 }
 0x27f   : > { %v3613_v54 = vrot.slane %v3599_v5, %v4352_v7  ;;  %v3581_v6 = vrot.slane %v3567_v37, %v4352_v7  ;;  %v3597_v18 = vrot.slane %v3583_v33, %v4352_v7  ;;  %v3545_v31 = vcombine.high %v3493_v16, %v3525_v52 }
 0x280   : > { %v3646_v9 = vcombine.low %v3590_v2, %v3606_v57  ;;  %v3647_v13 = vcombine.high %v3590_v2, %v3606_v57  ;;  %v3502_v49 = vrot.slane %v3494_v24, %v5927_v63  ;;  %v3509_v26 = vrot.slane %v3495_v4, %v5927_v63 }
 0x281   : > { %v3541_v11 = vrot.slane %v3527_v35, %v5927_v63  ;;  %v3565_v8 = vrot.slane %v3551_v19, %v4352_v7  ;;  %v3662_v27 = vcombine.low %v3597_v18, %v3613_v54  ;;  %v3663_v44 = vcombine.high %v3597_v18, %v3613_v54 }
 0x282   : > { %v3654_v32 = vrot.slane %v3646_v9, %v5927_v63  ;;  %v3661_v53 = vrot.slane %v3647_v13, %v5927_v63  ;;  %v3546_v10 = vcombine.low %v3502_v49, %v3534_v21  ;;  %v3547_v51 = vcombine.high %v3502_v49, %v3534_v21 }
 0x283   : > { %v3630_v43 = vcombine.low %v3565_v8, %v3581_v6  ;;  %v3548_v61 = vcombine.low %v3509_v26, %v3541_v11  ;;  %v3670_v20 = vrot.slane %v3662_v27, %v5927_v63  ;;  %v3631_v22 = vcombine.high %v3565_v8, %v3581_v6 }
 0x284   : > { %v3679_v17 = vcombine.high %v3622_v0, %v3654_v32  ;;  %v3678_v47 = vcombine.low %v3622_v0, %v3654_v32  ;;  %v3681_v12 = vcombine.high %v3629_v60, %v3661_v53  ;;  %v3680_v38 = vcombine.low %v3629_v60, %v3661_v53 }
 0x285   : > { %v3638_v36 = vrot.slane %v3630_v43, %v5927_v63  ;;  %v3549_v7 = vcombine.high %v3509_v26, %v3541_v11  ;;  %v3677_v29 = vrot.slane %v3663_v44, %v5927_v63  ;;  %v3645_v34 = vrot.slane %v3631_v22, %v5927_v63 }
 0x286   : > { %3719 = vrot.lane.b32.xlu0 %v3679_v17, %s4227_s10  ;;  %3715 = vrot.lane.b32.xlu1 %v3678_v47, %s4228_s11  ;;  %s4233_s10 = smov 24   ;;  %s4234_s11 = smov 48  }
 0x287   : > { %v3682_v39 = vcombine.low %v3638_v36, %v3670_v20  ;;  %v3684_v56 = vcombine.low %v3645_v34, %v3677_v29  ;;  %v3683_v45 = vcombine.high %v3638_v36, %v3670_v20  ;;  %v3685_v57 = vcombine.high %v3645_v34, %v3677_v29 }
 0x28a   : > { %3727 = vrot.lane.b32.xlu0 %v3681_v12, %s4224_s6  ;;  %3723 = vrot.lane.b32.xlu1 %v3680_v38, %s4226_s9  ;;  %s4231_s6 = smov 8   ;;  %s4232_s9 = smov 32  }
 0x28e   : > { %3691 = vrot.lane.b32.xlu1 %v3544_v28, %s4230_s24  ;;  %3687 = vrot.lane.b32.xlu0 %v3543_v1, %s4231_s6 }
 0x292   : > { %3699 = vrot.lane.b32.xlu1 %v3546_v10, %s4232_s9  ;;  %3695 = vrot.lane.b32.xlu0 %v3545_v31, %s4233_s10 }
 0x296   : > { %3707 = vrot.lane.b32.xlu1 %v3548_v61, %s4234_s11  ;;  %3703 = vrot.lane.b32.xlu0 %v3547_v51, %s4235_s12  ;;  %s4237_s11 = smov [#allocation3]  }
 0x297   : > { %s4128_s12 = sshll.u32 %s4237_s11, 4  ;;  %s4129_s12 = int_to_ptr.vmem [resolvable:$false] %s4128_s12 }
 0x29a   : > { %3731 = vrot.lane.b32.xlu1 %v3682_v39, %s4225_s8  ;;  %3711 = vrot.lane.b32.xlu0 %v3549_v7, %s4236_s13  ;;  %s4130_s13 = scalar_lea.vmem %s4129_s12, 256 }
 0x29e   : > { %3739 = vrot.lane.b32.xlu1 %v3684_v56, %s4221_s27  ;;  %3735 = vrot.lane.b32.xlu0 %v3683_v45, %s4222_s30  ;;  %s202_s27 = sand.u32 1, %s4192_s16  }
 0x29f   : > { %s5986_s30 = sshll.u32 %s202_s27, 3  ;;  %s3777_s9 = scalar_lea.sflag [#allocation4], %s202_s27 }
 0x2a2   : > { %3743 = vrot.lane.b32.xlu0 %v3685_v57, %s4223_s5  ;;  %s3912_s5 = sshll.u32 %s4204_s19, 1  ;;  %s204_s19 = scalar_lea.vmem [#allocation3], %s5986_s30 }
 0x2a3   : > { %s3788_s8 = sadd.s32 %s4200_s18, %s3912_s5  ;;  %s3792_s23 = sshll.u32 %s204_s19, 4  ;;  %s3793_s23 = int_to_ptr.vmem [resolvable:$true] %s3792_s23 }
 0x2a4   : > { %s3913_s14 = sshll.u32 %s3788_s8, 7  ;;  %s4124_s10 = scalar_lea.vmem %s3793_s23, 128 }
 0x2a5   : > { %s5994_s6 = scalar_lea.hbm %s6046_s4, %s3913_s14  ;;  %p4125_p13 = scmp.ne.s32.totalorder %s3793_s23, %s4124_s10 }
 0x2a6   : > { %p4131_p2 = scmp.lt.s32.totalorder %s3793_s23, %s4129_s12  ;;  %p4132_p4 = scmp.lt.s32.totalorder %s4130_s13, %s4124_s10 }
 0x2a7   : > { %p4126_p0 = pnand %p4125_p13, %p4314_p3 }
 0x2a8   : > { %p4133_p5 = por %p4132_p4, %p4131_p2 }
 0x2a9   : > { %p4127_p1 = pneg %p4126_p0 }
 0x2ab   : > { %p4134_p6 = pnand %p4133_p5, %p4127_p1 }
 0x2f8   : > { %v3720_v2 = vpop.permute.xlu0 %3719  ;;  %v3716_v14 = vpop.permute.xlu1 %3715 }
 0x2fc   : > { %v3728_v59 = vpop.permute.xlu0 %3727  ;;  %v3724_v9 = vpop.permute.xlu1 %3723 }
 0x300   : > { %v3692_v13 = vpop.permute.xlu1 %3691  ;;  %v3688_v46 = vpop.permute.xlu0 %3687 }
 0x301   : > { %v3746_v63 = vsel %vm1702_vm3, %v3542_v55, %v3688_v46 }
 0x302   : > { %v3748_v32 = vsel %vm3747_vm5, %v3746_v63, %v3692_v13 }
 0x304   : > { %v3700_v23 = vpop.permute.xlu1 %3699  ;;  %v3696_v0 = vpop.permute.xlu0 %3695 }
 0x305   : > { %v3750_v50 = vsel %vm3749_vm6, %v3748_v32, %v3696_v0 }
 0x306   : > { %v3752_v41 = vsel %vm3751_vm7, %v3750_v50, %v3700_v23 }
 0x308   : > { %v3708_v15 = vpop.permute.xlu1 %3707  ;;  %v3704_v42 = vpop.permute.xlu0 %3703 }
 0x309   : > { %v3754_v40 = vsel %vm3753_vm8, %v3752_v41, %v3704_v42 }
 0x30a   : > { %v3756_v48 = vsel %vm3755_vm9, %v3754_v40, %v3708_v15 }
 0x30c   : > { %v3712_v30 = vpop.permute.xlu0 %3711  ;;  %v3732_v55 = vpop.permute.xlu1 %3731 }
 0x30d   : > { %v3758_v17 = vsel %vm3757_vm10, %v3756_v48, %v3712_v30 }
 0x30e   : > { %v3760_v47 = vsel %vm3759_vm11, %v3758_v17, %v3716_v14 }
 0x30f   : > { %v3762_v53 = vsel %vm3761_vm12, %v3760_v47, %v3720_v2 }
 0x310   : > { %v3736_v3 = vpop.permute.xlu0 %3735  ;;  %v3764_v58 = vsel %vm3763_vm13, %v3762_v53, %v3724_v9  ;;  %v3740_v16 = vpop.permute.xlu1 %3739 }
 0x311   : > { %v3766_v60 = vsel %vm3765_vm14, %v3764_v58, %v3728_v59 }
 0x312   : > { %v3768_v25 = vsel %vm3767_vm15, %v3766_v60, %v3732_v55 }
 0x313   : > { %v3770_v52 = vsel %vm3769_vm0, %v3768_v25, %v3736_v3 }
 0x314   : > { %v3744_v24 = vpop.permute.xlu0 %3743  ;;  %v3772_v12 = vsel %vm3771_vm1, %v3770_v52, %v3740_v16 }
 0x315   : > { %v3774_v38 = vsel %vm3773_vm2, %v3772_v12, %v3744_v24 }
 0x316   : > { %3775 = vst [vmem:[%s204_s19] sm:$0xff] %v3774_v38 }
 0x317   : > { %4137 = shalt.err (!%p4134_p6)
}
 0x318   : > { %s4138_s30 = scalar_lea.hbm %s5994_s6, 128  ;;  %s4142_s8 = scalar_lea.hbm %s6046_s4, 512 }
 0x319   : > { %p4139_p7 = scmp.ne.s32.totalorder %s5994_s6, %s4138_s30  ;;  %p4143_p11 = scmp.lt.s32.totalorder %s5994_s6, %s6046_s4 }
 0x31a   : > { %p4144_p12 = scmp.lt.s32.totalorder %s4142_s8, %s4138_s30 }
 0x31b   : > { %p4140_p9 = pnand %p4139_p7, %p4314_p3 }
 0x31c   : > { %p4145_p13 = por %p4144_p12, %p4143_p11 }
 0x31d   : > { %p4141_p10 = pneg %p4140_p9 }
 0x31f   : > { %p4146_p0 = pnand %p4145_p13, %p4141_p10 }
 0x321   : > { %4149 = shalt.err (!%p4146_p0)
}
 0x322   : > { %4014 = dma.vmem_to_hbm [thread:$0]  (%p4314_p3), %s3793_s23, 128, %s5994_s6, %s3777_s9  }
 0x323 PF: > { %p4020_p1 = scmp.ge.s32.totalorder %s4216_s22, 2  ;;  %s3804_s24 = sand.u32 1, %s4188_s15  }
 0x324   : > { %s3805_s18 = scalar_lea.sflag [#allocation4], %s3804_s24 }
 0x325   : > { %p4017_p2 = pnand %p4020_p1, %p4323_p8 }
 0x327   : > { %p4018_p4 = pneg %p4017_p2 }
 0x329   : > { %4183 = dma.done.wait (%p4018_p4), %s3805_s18, 128  }
 0x32a   : > { %4185 = vsyncadd (%p4018_p4), %s3805_s18, 4294967168  ;;  %s17_s22 = sadd.s32 1, %s4216_s22   ;;  %s6124_s15 = smov %s4192_s16 }
 0x32b   : > { %p14_p5 = scmp.ge.s32.totalorder %s17_s22, 6   ;;  %s6125_s16 = smov %s4196_s17 }
 0x32c   : > { %s6126_s17 = smov %s4332_s7  ;;  %s6127_s18 = smov %s4208_s20 }
 0x32d   : > { %s6128_s19 = smov %s4212_s21  ;;  %s6129_s20 = smov %s6132_s25 }
 0x32e   : > { %s6130_s21 = smov %s6136_s26  ;;  %16 = sbr.rel (!%p14_p5) target bundleno = 5 (0x5), region = 72 }
 0x333   :  { %3810 = vsyncpa [#allocation4], 1 }
 0x334   :  { %3812 = vsyncpa [#allocation4 + $0x1], 1 }

</bundles_post_ra>
